<compile_context>
chip_gen: v7x
topology: tpu7x:2x2x1
jax: 0.10.0
libtpu: 0.0.40
codegen_flags: <defaults>
</compile_context>

<pallas_src>
import numpy as np
import jax
import jax.numpy as jnp
from jax import lax
from jax.experimental import pallas as pl
from jax.experimental.pallas import tpu as pltpu

# ----------------------- hyper-params (stand-ins for `opt`) ------------------
LATENT_DIM = 32     # opt.latent_dim
IMG_SIZE   = 16     # opt.img_size
CHANNELS   = 3      # opt.channels
FEAT_MAPS  = 8      # Generator(feat_maps)
INIT_SIZE  = IMG_SIZE // 4
BATCH      = 2

LRELU_SLOPE = 0.2
BN1_EPS = 1e-5      # nn.BatchNorm2d(F)
BN_EPS  = 0.8       # nn.BatchNorm2d(F, 0.8) -> eps = 0.8


# --------------------- host-side (trace-time) constant builders --------------
def _upsample_matrix_np(batch, h0):
    """0/1 matrix U with (x @ U) = 2x nearest-neighbour upsampling.

    Rows indexed by b*h0*h0 + s0, columns by b*(2*h0)**2 + s1, i.e. the
    batch-major flattened-HW lane layout used inside the kernel."""
    h1 = 2 * h0
    s0, s1 = h0 * h0, h1 * h1
    p = np.arange(batch * s0)[:, None]
    q = np.arange(batch * s1)[None, :]
    bp, sp = p // s0, p % s0
    bq, sq = q // s1, q % s1
    src = (sq // h1 // 2) * h0 + (sq % h1) // 2
    return ((bp == bq) & (sp == src)).astype(np.float32)


def _conv_masks_np(batch, hw):
    """(9, B*hw*hw) boundary masks for the 9 taps of a 3x3 / pad-1 conv.

    Tap k = dy*3+dx is valid at lane r iff the source pixel (h+dy-1, w+dx-1)
    lies inside the image.  NOTE: conv correctness relies on the batch-major
    lane layout (r = b*hw*hw + h*hw + w) together with this mask zeroing all
    wrapped / out-of-image taps, so a lane roll never contaminates across a
    batch or image boundary."""
    r = np.arange(batch * hw * hw)
    h = (r // hw) % hw
    w = r % hw
    m = np.zeros((9, r.size), np.float32)
    for dy in range(3):
        for dx in range(3):
            hh, ww = h + dy - 1, w + dx - 1
            m[dy * 3 + dx] = ((hh >= 0) & (hh < hw) & (ww >= 0) & (ww < hw))
    return m


def _pack_conv_w(w):
    """(Cout, Cin, 3, 3) -> (Cout, 9*Cin); column block k=dy*3+dx is W[:,:,dy,dx]."""
    co, ci = w.shape[0], w.shape[1]
    return jnp.transpose(w, (0, 2, 3, 1)).reshape(co, 9 * ci)


# ----------------------------- fused Pallas kernel ---------------------------
def _make_generator_kernel(B, F, CH, IS):
    F2 = F // 2
    H1, H2 = 2 * IS, 4 * IS
    S2 = H2 * H2

    def _bn(x, gamma, beta, eps):
        """Training-mode BatchNorm2d: channels on sublanes, B*H*W on lanes."""
        mean = jnp.mean(x, axis=1, keepdims=True)
        var = jnp.mean((x - mean) ** 2, axis=1, keepdims=True)   # biased var
        return gamma * (x - mean) * lax.rsqrt(var + eps) + beta

    def _lrelu(x):
        return jnp.where(x > 0, x, LRELU_SLOPE * x)

    def _conv3x3(x, w_bf16, bias, masks, hw):
        """3x3 / stride 1 / pad 1 conv as ONE MXU matmul.

        x:      (Cin, R) f32, lanes = batch-major flattened HW (R = B*hw*hw)
        w_bf16: (Cout, 9*Cin) bf16; column block k=dy*3+dx holds W[:, :, dy, dx]
        masks:  (9, R) f32 precomputed boundary masks
        returns (Cout, R) f32
        """
        R = x.shape[1]
        pieces = []
        for dy in range(3):
            for dx in range(3):
                k = dy * 3 + dx
                shift = (dy - 1) * hw + (dx - 1)          # lane offset of the tap
                xs = x if shift == 0 else pltpu.roll(x, (-shift) % R, axis=1)
                pieces.append(xs * masks[k:k + 1, :])     # zero invalid taps (f32)
        # Stack taps along sublanes and do a single K=9*Cin matmul (bf16 in,
        # f32 accumulate).
        xstack = jnp.concatenate(pieces, axis=0).astype(jnp.bfloat16)  # (9*Cin, R)
        y = jnp.dot(w_bf16, xstack, preferred_element_type=jnp.float32)
        return y + bias                                   # bias (Cout, 1)

    def kernel(x0_ref, up0_ref, up1_ref, w1_ref, w2_ref, w3_ref,
               m1_ref, m2_ref, scal_ref, out_ref):
        # Packed per-channel params: columns = [bn1_g, bn1_b, c1_b, bn2_g,
        # bn2_b, c2_b, bn3_g, bn3_b, c3_b], rows = channel (padded to F).
        scal = scal_ref[...]                              # (F, 9) f32
        g1, b1 = scal[:, 0:1], scal[:, 1:2]
        cb1, g2, b2 = scal[:, 2:3], scal[:, 3:4], scal[:, 4:5]
        cb2, g3, b3 = scal[:F2, 5:6], scal[:F2, 6:7], scal[:F2, 7:8]
        cb3 = scal[:CH, 8:9]

        m1 = m1_ref[...]                                  # (9, B*H1*H1)
        m2 = m2_ref[...]                                  # (9, B*H2*H2)

        # ---- BatchNorm2d(F) on the linear output (F, B*S0) ------------------
        x = _bn(x0_ref[...], g1, b1, BN1_EPS)

        # ---- Upsample(2): (F, B*S0) -> (F, B*S1); exact 0/1 selection matmul
        x = jnp.dot(x, up0_ref[...], preferred_element_type=jnp.float32)

        # ---- Conv2d(F, F, 3, p=1) + BatchNorm2d(F, 0.8) + LeakyReLU(0.2) ----
        x = _conv3x3(x, w1_ref[...], cb1, m1, H1)
        x = _lrelu(_bn(x, g2, b2, BN_EPS))

        # ---- Upsample(2): (F, B*S1) -> (F, B*S2) ----------------------------
        x = jnp.dot(x, up1_ref[...], preferred_element_type=jnp.float32)

        # ---- Conv2d(F, F//2, 3, p=1) + BatchNorm2d(F//2, 0.8) + LeakyReLU ---
        x = _conv3x3(x, w2_ref[...], cb2, m2, H2)
        x = _lrelu(_bn(x, g3, b3, BN_EPS))

        # ---- Conv2d(F//2, channels, 3, p=1) + Tanh ---------------------------
        x = jnp.tanh(_conv3x3(x, w3_ref[...], cb3, m2, H2))   # (CH, B*S2)

        # ---- Store as (B*CH, S2) with direct, lane-aligned slice stores ------
        for b in range(B):
            out_ref[b * CH:(b + 1) * CH, :] = x[:, b * S2:(b + 1) * S2]

    return kernel


# ------------------------------- forward wrapper ------------------------------
@jax.jit
def generator_forward(z, params):
    B, L = z.shape
    F, F2, CH, IS = FEAT_MAPS, FEAT_MAPS // 2, CHANNELS, INIT_SIZE
    H0, H1, H2 = IS, 2 * IS, 4 * IS
    S0, S1, S2 = H0 * H0, H1 * H1, H2 * H2

    # --- l1 Linear in the wrapper (tiny; per perf review), emitted directly
    #     in the kernel's lane-dense (F, B*S0) layout --------------------------
    x0 = jnp.dot(z, params["l1_w"], precision=lax.Precision.HIGHEST) + params["l1_b"]
    x0 = x0.reshape(B, F, S0).transpose(1, 0, 2).reshape(F, B * S0)

    # --- data-independent constants (numpy at trace time -> baked constants) -
    up0 = jnp.asarray(_upsample_matrix_np(B, H0))     # (B*S0, B*S1)
    up1 = jnp.asarray(_upsample_matrix_np(B, H1))     # (B*S1, B*S2)
    m1 = jnp.asarray(_conv_masks_np(B, H1))           # (9, B*S1)
    m2 = jnp.asarray(_conv_masks_np(B, H2))           # (9, B*S2)

    # --- conv weights repacked as (Cout, 9*Cin) bf16 MXU operands -------------
    w1 = _pack_conv_w(params["c1_w"]).astype(jnp.bfloat16)
    w2 = _pack_conv_w(params["c2_w"]).astype(jnp.bfloat16)
    w3 = _pack_conv_w(params["c3_w"]).astype(jnp.bfloat16)

    # --- all per-channel vectors packed into one (F, 9) slab ------------------
    def pad_f(a):
        v = a.reshape(-1)
        return jnp.pad(v, (0, F - v.shape[0]))
    scal = jnp.stack(
        [pad_f(params["bn1_g"]), pad_f(params["bn1_b"]),
         pad_f(params["c1_b"]), pad_f(params["bn2_g"]), pad_f(params["bn2_b"]),
         pad_f(params["c2_b"]), pad_f(params["bn3_g"]), pad_f(params["bn3_b"]),
         pad_f(params["c3_b"])], axis=1)              # (F, 9)

    kernel = _make_generator_kernel(B, F, CH, IS)

    # Advisory cost so XLA schedules this latency-bound custom call sensibly.
    flops = 2 * (F * (B * S0) * (B * S1) + F * (B * S1) * (B * S2)   # upsamples
                 + F * 9 * F * B * S1 + F2 * 9 * F * B * S2          # conv1/2
                 + CH * 9 * F2 * B * S2)                             # conv3
    bytes_accessed = (4 * (F * B * S0 + up0.size + up1.size + m1.size + m2.size
                           + scal.size + B * CH * S2)
                      + 2 * (w1.size + w2.size + w3.size))

    inputs = (x0, up0, up1, w1, w2, w3, m1, m2, scal)
    out = pl.pallas_call(
        kernel,
        out_shape=jax.ShapeDtypeStruct((B * CH, S2), jnp.float32),
        in_specs=[pl.BlockSpec(memory_space=pltpu.MemorySpace.VMEM)] * len(inputs),
        out_specs=pl.BlockSpec(memory_space=pltpu.MemorySpace.VMEM),
        cost_estimate=pl.CostEstimate(flops=flops, transcendentals=B * CH * S2,
                                      bytes_accessed=bytes_accessed),
        # TODO(synk): for non-toy batch / image sizes, add a "parallel" grid
        # axis over batch (making up0/up1/m1/m2 batch-independent) so both v7x
        # TensorCores are used and the working set fits v7x's 64 MiB VMEM.
    )(*inputs)

    # (B*CH, H*W) -> NCHW: a free reshape, no transpose / relayout.
    return out.reshape(B, CH, H2, H2)


# ------------------------------ params & reference ----------------------------
def init_params(key):
    F, L, IS, CH = FEAT_MAPS, LATENT_DIM, INIT_SIZE, CHANNELS
    ks = jax.random.split(key, 14)
    p = {}
    p["l1_w"]  = 0.1 * jax.random.normal(ks[0],  (L, F * IS * IS), jnp.float32)
    p["l1_b"]  = 0.1 * jax.random.normal(ks[1],  (1, F * IS * IS), jnp.float32)
    p["bn1_g"] = 1.0 + 0.1 * jax.random.normal(ks[2], (1, F), jnp.float32)
    p["bn1_b"] = 0.1 * jax.random.normal(ks[3],  (1, F), jnp.float32)
    p["c1_w"]  = 0.1 * jax.random.normal(ks[4],  (F, F, 3, 3), jnp.float32)
    p["c1_b"]  = 0.1 * jax.random.normal(ks[5],  (1, F), jnp.float32)
    p["bn2_g"] = 1.0 + 0.1 * jax.random.normal(ks[6], (1, F), jnp.float32)
    p["bn2_b"] = 0.1 * jax.random.normal(ks[7],  (1, F), jnp.float32)
    p["c2_w"]  = 0.1 * jax.random.normal(ks[8],  (F // 2, F, 3, 3), jnp.float32)
    p["c2_b"]  = 0.1 * jax.random.normal(ks[9],  (1, F // 2), jnp.float32)
    p["bn3_g"] = 1.0 + 0.1 * jax.random.normal(ks[10], (1, F // 2), jnp.float32)
    p["bn3_b"] = 0.1 * jax.random.normal(ks[11], (1, F // 2), jnp.float32)
    p["c3_w"]  = 0.1 * jax.random.normal(ks[12], (CH, F // 2, 3, 3), jnp.float32)
    p["c3_b"]  = 0.1 * jax.random.normal(ks[13], (1, CH), jnp.float32)
    return p


def reference_forward(z, params):
    """Pure-JAX reference (mirrors the PyTorch module, training-mode BN)."""
    F, IS = FEAT_MAPS, INIT_SIZE
    B = z.shape[0]
    hi = jax.lax.Precision.HIGHEST

    def bn(x, g, b, eps):
        mean = jnp.mean(x, axis=(0, 2, 3), keepdims=True)
        var = jnp.mean((x - mean) ** 2, axis=(0, 2, 3), keepdims=True)
        return (g.reshape(1, -1, 1, 1) * (x - mean) * jax.lax.rsqrt(var + eps)
                + b.reshape(1, -1, 1, 1))

    def up2(x):
        return jnp.repeat(jnp.repeat(x, 2, axis=2), 2, axis=3)

    def conv(x, w, b):
        y = jax.lax.conv_general_dilated(
            x, w, window_strides=(1, 1), padding="SAME",
            dimension_numbers=("NCHW", "OIHW", "NCHW"), precision=hi)
        return y + b.reshape(1, -1, 1, 1)

    def lrelu(x):
        return jnp.where(x > 0, x, LRELU_SLOPE * x)

    x = (jnp.dot(z, params["l1_w"], precision=hi) + params["l1_b"])
    x = x.reshape(B, F, IS, IS)
    x = bn(x, params["bn1_g"], params["bn1_b"], BN1_EPS)
    x = up2(x)
    x = conv(x, params["c1_w"], params["c1_b"])
    x = lrelu(bn(x, params["bn2_g"], params["bn2_b"], BN_EPS))
    x = up2(x)
    x = conv(x, params["c2_w"], params["c2_b"])
    x = lrelu(bn(x, params["bn3_g"], params["bn3_b"], BN_EPS))
    x = conv(x, params["c3_w"], params["c3_b"])
    return jnp.tanh(x)


if __name__ == "__main__":
    key = jax.random.PRNGKey(0)
    kz, kp = jax.random.split(key)
    z = jax.random.normal(kz, (BATCH, LATENT_DIM), jnp.float32)
    params = init_params(kp)

    img = generator_forward(z, params)
    jax.block_until_ready(img)

    assert img.shape == (BATCH, CHANNELS, IMG_SIZE, IMG_SIZE), img.shape
    assert bool(jnp.all(jnp.isfinite(img)))

    ref = reference_forward(z, params)
    max_err = float(jnp.max(jnp.abs(img - ref)))
    assert jnp.allclose(img, ref, rtol=1e-2, atol=1e-2), max_err

    print("KERNEL_OK")
</pallas_src>

<mosaic_0001>
module attributes {stable_mosaic.version = 11 : i64} {
  func.func @kernel(%arg0: memref<8x32xf32, #tpu.memory_space<vmem>>, %arg1: memref<32x128xf32, #tpu.memory_space<vmem>>, %arg2: memref<128x512xf32, #tpu.memory_space<vmem>>, %arg3: memref<8x72xbf16, #tpu.memory_space<vmem>>, %arg4: memref<4x72xbf16, #tpu.memory_space<vmem>>, %arg5: memref<3x36xbf16, #tpu.memory_space<vmem>>, %arg6: memref<9x128xf32, #tpu.memory_space<vmem>>, %arg7: memref<9x512xf32, #tpu.memory_space<vmem>>, %arg8: memref<8x9xf32, #tpu.memory_space<vmem>>, %arg9: memref<6x256xf32, #tpu.memory_space<vmem>>) attributes {dimension_semantics = [], scalar_prefetch = 0 : i64, scratch_operands = 0 : i64, tpu.core_type = #tpu.core_type<tc>} {
    %c0 = arith.constant 0 : index
    %c0_0 = arith.constant 0 : index
    %0 = vector.load %arg8[%c0, %c0_0] : memref<8x9xf32, #tpu.memory_space<vmem>>, vector<8x9xf32>
    %1 = vector.extract_strided_slice %0 {offsets = [0, 0], sizes = [8, 1], strides = [1, 1]} : vector<8x9xf32> to vector<8x1xf32>
    %2 = vector.extract_strided_slice %0 {offsets = [0, 1], sizes = [8, 1], strides = [1, 1]} : vector<8x9xf32> to vector<8x1xf32>
    %3 = vector.extract_strided_slice %0 {offsets = [0, 2], sizes = [8, 1], strides = [1, 1]} : vector<8x9xf32> to vector<8x1xf32>
    %4 = vector.extract_strided_slice %0 {offsets = [0, 3], sizes = [8, 1], strides = [1, 1]} : vector<8x9xf32> to vector<8x1xf32>
    %5 = vector.extract_strided_slice %0 {offsets = [0, 4], sizes = [8, 1], strides = [1, 1]} : vector<8x9xf32> to vector<8x1xf32>
    %6 = vector.extract_strided_slice %0 {offsets = [0, 5], sizes = [4, 1], strides = [1, 1]} : vector<8x9xf32> to vector<4x1xf32>
    %7 = vector.extract_strided_slice %0 {offsets = [0, 6], sizes = [4, 1], strides = [1, 1]} : vector<8x9xf32> to vector<4x1xf32>
    %8 = vector.extract_strided_slice %0 {offsets = [0, 7], sizes = [4, 1], strides = [1, 1]} : vector<8x9xf32> to vector<4x1xf32>
    %9 = vector.extract_strided_slice %0 {offsets = [0, 8], sizes = [3, 1], strides = [1, 1]} : vector<8x9xf32> to vector<3x1xf32>
    %c0_1 = arith.constant 0 : index
    %c0_2 = arith.constant 0 : index
    %10 = vector.load %arg6[%c0_1, %c0_2] : memref<9x128xf32, #tpu.memory_space<vmem>>, vector<9x128xf32>
    %c0_3 = arith.constant 0 : index
    %c0_4 = arith.constant 0 : index
    %11 = vector.load %arg7[%c0_3, %c0_4] : memref<9x512xf32, #tpu.memory_space<vmem>>, vector<9x512xf32>
    %c0_5 = arith.constant 0 : index
    %c0_6 = arith.constant 0 : index
    %12 = vector.load %arg0[%c0_5, %c0_6] : memref<8x32xf32, #tpu.memory_space<vmem>>, vector<8x32xf32>
    %cst = arith.constant dense<0.000000e+00> : vector<8xf32>
    %13 = vector.multi_reduction <add>, %12, %cst [1] : vector<8x32xf32> to vector<8xf32>
    %14 = vector.shape_cast %13 : vector<8xf32> to vector<8x1xf32>
    %cst_7 = arith.constant 3.200000e+01 : f32
    %15 = vector.broadcast %cst_7 : f32 to vector<8x1xf32>
    %16 = arith.divf %14, %15 : vector<8x1xf32>
    %17 = vector.broadcast %16 : vector<8x1xf32> to vector<8x32xf32>
    %18 = arith.subf %12, %17 : vector<8x32xf32>
    %19 = arith.mulf %18, %18 : vector<8x32xf32>
    %cst_8 = arith.constant dense<0.000000e+00> : vector<8xf32>
    %20 = vector.multi_reduction <add>, %19, %cst_8 [1] : vector<8x32xf32> to vector<8xf32>
    %21 = vector.shape_cast %20 : vector<8xf32> to vector<8x1xf32>
    %cst_9 = arith.constant 3.200000e+01 : f32
    %22 = vector.broadcast %cst_9 : f32 to vector<8x1xf32>
    %23 = arith.divf %21, %22 : vector<8x1xf32>
    %24 = vector.broadcast %16 : vector<8x1xf32> to vector<8x32xf32>
    %25 = arith.subf %12, %24 : vector<8x32xf32>
    %26 = vector.broadcast %1 : vector<8x1xf32> to vector<8x32xf32>
    %27 = arith.mulf %26, %25 : vector<8x32xf32>
    %cst_10 = arith.constant 9.99999974E-6 : f32
    %28 = vector.broadcast %cst_10 : f32 to vector<8x1xf32>
    %29 = arith.addf %23, %28 : vector<8x1xf32>
    %30 = math.rsqrt %29 : vector<8x1xf32>
    %31 = vector.broadcast %30 : vector<8x1xf32> to vector<8x32xf32>
    %32 = arith.mulf %27, %31 : vector<8x32xf32>
    %33 = vector.broadcast %2 : vector<8x1xf32> to vector<8x32xf32>
    %34 = arith.addf %32, %33 : vector<8x32xf32>
    %c0_11 = arith.constant 0 : index
    %c0_12 = arith.constant 0 : index
    %35 = vector.load %arg1[%c0_11, %c0_12] : memref<32x128xf32, #tpu.memory_space<vmem>>, vector<32x128xf32>
    %cst_13 = arith.constant dense<0.000000e+00> : vector<8x128xf32>
    %36 = tpu.matmul %34, %35, %cst_13 {dimension_numbers = #tpu.dot_dimension_numbers<[1], [0], [0], [1], [0, 0, 1, 1], [], []>} : vector<8x32xf32>, vector<32x128xf32>, vector<8x128xf32> -> vector<8x128xf32>
    %c0_14 = arith.constant 0 : index
    %c0_15 = arith.constant 0 : index
    %37 = vector.load %arg3[%c0_14, %c0_15] : memref<8x72xbf16, #tpu.memory_space<vmem>>, vector<8x72xbf16>
    %c9_i32 = arith.constant 9 : i32
    %38 = tpu.dynamic_rotate %36 by %c9_i32 dim 1 : vector<8x128xf32>, i32 -> vector<8x128xf32>
    %39 = vector.extract_strided_slice %10 {offsets = [0, 0], sizes = [1, 128], strides = [1, 1]} : vector<9x128xf32> to vector<1x128xf32>
    %40 = vector.broadcast %39 : vector<1x128xf32> to vector<8x128xf32>
    %41 = arith.mulf %38, %40 : vector<8x128xf32>
    %c8_i32 = arith.constant 8 : i32
    %42 = tpu.dynamic_rotate %36 by %c8_i32 dim 1 : vector<8x128xf32>, i32 -> vector<8x128xf32>
    %43 = vector.extract_strided_slice %10 {offsets = [1, 0], sizes = [1, 128], strides = [1, 1]} : vector<9x128xf32> to vector<1x128xf32>
    %44 = vector.broadcast %43 : vector<1x128xf32> to vector<8x128xf32>
    %45 = arith.mulf %42, %44 : vector<8x128xf32>
    %c7_i32 = arith.constant 7 : i32
    %46 = tpu.dynamic_rotate %36 by %c7_i32 dim 1 : vector<8x128xf32>, i32 -> vector<8x128xf32>
    %47 = vector.extract_strided_slice %10 {offsets = [2, 0], sizes = [1, 128], strides = [1, 1]} : vector<9x128xf32> to vector<1x128xf32>
    %48 = vector.broadcast %47 : vector<1x128xf32> to vector<8x128xf32>
    %49 = arith.mulf %46, %48 : vector<8x128xf32>
    %c1_i32 = arith.constant 1 : i32
    %50 = tpu.dynamic_rotate %36 by %c1_i32 dim 1 : vector<8x128xf32>, i32 -> vector<8x128xf32>
    %51 = vector.extract_strided_slice %10 {offsets = [3, 0], sizes = [1, 128], strides = [1, 1]} : vector<9x128xf32> to vector<1x128xf32>
    %52 = vector.broadcast %51 : vector<1x128xf32> to vector<8x128xf32>
    %53 = arith.mulf %50, %52 : vector<8x128xf32>
    %54 = vector.extract_strided_slice %10 {offsets = [4, 0], sizes = [1, 128], strides = [1, 1]} : vector<9x128xf32> to vector<1x128xf32>
    %55 = vector.broadcast %54 : vector<1x128xf32> to vector<8x128xf32>
    %56 = arith.mulf %36, %55 : vector<8x128xf32>
    %c127_i32 = arith.constant 127 : i32
    %57 = tpu.dynamic_rotate %36 by %c127_i32 dim 1 : vector<8x128xf32>, i32 -> vector<8x128xf32>
    %58 = vector.extract_strided_slice %10 {offsets = [5, 0], sizes = [1, 128], strides = [1, 1]} : vector<9x128xf32> to vector<1x128xf32>
    %59 = vector.broadcast %58 : vector<1x128xf32> to vector<8x128xf32>
    %60 = arith.mulf %57, %59 : vector<8x128xf32>
    %c121_i32 = arith.constant 121 : i32
    %61 = tpu.dynamic_rotate %36 by %c121_i32 dim 1 : vector<8x128xf32>, i32 -> vector<8x128xf32>
    %62 = vector.extract_strided_slice %10 {offsets = [6, 0], sizes = [1, 128], strides = [1, 1]} : vector<9x128xf32> to vector<1x128xf32>
    %63 = vector.broadcast %62 : vector<1x128xf32> to vector<8x128xf32>
    %64 = arith.mulf %61, %63 : vector<8x128xf32>
    %c120_i32 = arith.constant 120 : i32
    %65 = tpu.dynamic_rotate %36 by %c120_i32 dim 1 : vector<8x128xf32>, i32 -> vector<8x128xf32>
    %66 = vector.extract_strided_slice %10 {offsets = [7, 0], sizes = [1, 128], strides = [1, 1]} : vector<9x128xf32> to vector<1x128xf32>
    %67 = vector.broadcast %66 : vector<1x128xf32> to vector<8x128xf32>
    %68 = arith.mulf %65, %67 : vector<8x128xf32>
    %c119_i32 = arith.constant 119 : i32
    %69 = tpu.dynamic_rotate %36 by %c119_i32 dim 1 : vector<8x128xf32>, i32 -> vector<8x128xf32>
    %70 = vector.extract_strided_slice %10 {offsets = [8, 0], sizes = [1, 128], strides = [1, 1]} : vector<9x128xf32> to vector<1x128xf32>
    %71 = vector.broadcast %70 : vector<1x128xf32> to vector<8x128xf32>
    %72 = arith.mulf %69, %71 : vector<8x128xf32>
    %73 = tpu.concatenate %41, %45, %49, %53, %56, %60, %64, %68, %72 in 0 : vector<8x128xf32>, vector<8x128xf32>, vector<8x128xf32>, vector<8x128xf32>, vector<8x128xf32>, vector<8x128xf32>, vector<8x128xf32>, vector<8x128xf32>, vector<8x128xf32> -> vector<72x128xf32>
    %74 = arith.truncf %73 : vector<72x128xf32> to vector<72x128xbf16>
    %cst_16 = arith.constant dense<0.000000e+00> : vector<8x128xf32>
    %75 = tpu.matmul %37, %74, %cst_16 {dimension_numbers = #tpu.dot_dimension_numbers<[1], [0], [0], [1], [0, 0, 1, 1], [], []>} : vector<8x72xbf16>, vector<72x128xbf16>, vector<8x128xf32> -> vector<8x128xf32>
    %76 = vector.broadcast %3 : vector<8x1xf32> to vector<8x128xf32>
    %77 = arith.addf %75, %76 : vector<8x128xf32>
    %cst_17 = arith.constant dense<0.000000e+00> : vector<8xf32>
    %78 = vector.multi_reduction <add>, %77, %cst_17 [1] : vector<8x128xf32> to vector<8xf32>
    %79 = vector.shape_cast %78 : vector<8xf32> to vector<8x1xf32>
    %cst_18 = arith.constant 1.280000e+02 : f32
    %80 = vector.broadcast %cst_18 : f32 to vector<8x1xf32>
    %81 = arith.divf %79, %80 : vector<8x1xf32>
    %82 = vector.broadcast %81 : vector<8x1xf32> to vector<8x128xf32>
    %83 = arith.subf %77, %82 : vector<8x128xf32>
    %84 = arith.mulf %83, %83 : vector<8x128xf32>
    %cst_19 = arith.constant dense<0.000000e+00> : vector<8xf32>
    %85 = vector.multi_reduction <add>, %84, %cst_19 [1] : vector<8x128xf32> to vector<8xf32>
    %86 = vector.shape_cast %85 : vector<8xf32> to vector<8x1xf32>
    %cst_20 = arith.constant 1.280000e+02 : f32
    %87 = vector.broadcast %cst_20 : f32 to vector<8x1xf32>
    %88 = arith.divf %86, %87 : vector<8x1xf32>
    %89 = vector.broadcast %81 : vector<8x1xf32> to vector<8x128xf32>
    %90 = arith.subf %77, %89 : vector<8x128xf32>
    %91 = vector.broadcast %4 : vector<8x1xf32> to vector<8x128xf32>
    %92 = arith.mulf %91, %90 : vector<8x128xf32>
    %cst_21 = arith.constant 8.000000e-01 : f32
    %93 = vector.broadcast %cst_21 : f32 to vector<8x1xf32>
    %94 = arith.addf %88, %93 : vector<8x1xf32>
    %95 = math.rsqrt %94 : vector<8x1xf32>
    %96 = vector.broadcast %95 : vector<8x1xf32> to vector<8x128xf32>
    %97 = arith.mulf %92, %96 : vector<8x128xf32>
    %98 = vector.broadcast %5 : vector<8x1xf32> to vector<8x128xf32>
    %99 = arith.addf %97, %98 : vector<8x128xf32>
    %cst_22 = arith.constant 0.000000e+00 : f32
    %100 = vector.broadcast %cst_22 : f32 to vector<8x128xf32>
    %101 = arith.cmpf ogt, %99, %100 : vector<8x128xf32>
    %cst_23 = arith.constant 2.000000e-01 : f32
    %102 = vector.broadcast %cst_23 : f32 to vector<8x128xf32>
    %103 = arith.mulf %102, %99 : vector<8x128xf32>
    %104 = arith.select %101, %99, %103 : vector<8x128xi1>, vector<8x128xf32>
    %c0_24 = arith.constant 0 : index
    %c0_25 = arith.constant 0 : index
    %105 = vector.load %arg2[%c0_24, %c0_25] : memref<128x512xf32, #tpu.memory_space<vmem>>, vector<128x512xf32>
    %cst_26 = arith.constant dense<0.000000e+00> : vector<8x512xf32>
    %106 = tpu.matmul %104, %105, %cst_26 {dimension_numbers = #tpu.dot_dimension_numbers<[1], [0], [0], [1], [0, 0, 1, 1], [], []>} : vector<8x128xf32>, vector<128x512xf32>, vector<8x512xf32> -> vector<8x512xf32>
    %c0_27 = arith.constant 0 : index
    %c0_28 = arith.constant 0 : index
    %107 = vector.load %arg4[%c0_27, %c0_28] : memref<4x72xbf16, #tpu.memory_space<vmem>>, vector<4x72xbf16>
    %c17_i32 = arith.constant 17 : i32
    %108 = tpu.dynamic_rotate %106 by %c17_i32 dim 1 : vector<8x512xf32>, i32 -> vector<8x512xf32>
    %109 = vector.extract_strided_slice %11 {offsets = [0, 0], sizes = [1, 512], strides = [1, 1]} : vector<9x512xf32> to vector<1x512xf32>
    %110 = vector.broadcast %109 : vector<1x512xf32> to vector<8x512xf32>
    %111 = arith.mulf %108, %110 : vector<8x512xf32>
    %c16_i32 = arith.constant 16 : i32
    %112 = tpu.dynamic_rotate %106 by %c16_i32 dim 1 : vector<8x512xf32>, i32 -> vector<8x512xf32>
    %113 = vector.extract_strided_slice %11 {offsets = [1, 0], sizes = [1, 512], strides = [1, 1]} : vector<9x512xf32> to vector<1x512xf32>
    %114 = vector.broadcast %113 : vector<1x512xf32> to vector<8x512xf32>
    %115 = arith.mulf %112, %114 : vector<8x512xf32>
    %c15_i32 = arith.constant 15 : i32
    %116 = tpu.dynamic_rotate %106 by %c15_i32 dim 1 : vector<8x512xf32>, i32 -> vector<8x512xf32>
    %117 = vector.extract_strided_slice %11 {offsets = [2, 0], sizes = [1, 512], strides = [1, 1]} : vector<9x512xf32> to vector<1x512xf32>
    %118 = vector.broadcast %117 : vector<1x512xf32> to vector<8x512xf32>
    %119 = arith.mulf %116, %118 : vector<8x512xf32>
    %c1_i32_29 = arith.constant 1 : i32
    %120 = tpu.dynamic_rotate %106 by %c1_i32_29 dim 1 : vector<8x512xf32>, i32 -> vector<8x512xf32>
    %121 = vector.extract_strided_slice %11 {offsets = [3, 0], sizes = [1, 512], strides = [1, 1]} : vector<9x512xf32> to vector<1x512xf32>
    %122 = vector.broadcast %121 : vector<1x512xf32> to vector<8x512xf32>
    %123 = arith.mulf %120, %122 : vector<8x512xf32>
    %124 = vector.extract_strided_slice %11 {offsets = [4, 0], sizes = [1, 512], strides = [1, 1]} : vector<9x512xf32> to vector<1x512xf32>
    %125 = vector.broadcast %124 : vector<1x512xf32> to vector<8x512xf32>
    %126 = arith.mulf %106, %125 : vector<8x512xf32>
    %c511_i32 = arith.constant 511 : i32
    %127 = tpu.dynamic_rotate %106 by %c511_i32 dim 1 : vector<8x512xf32>, i32 -> vector<8x512xf32>
    %128 = vector.extract_strided_slice %11 {offsets = [5, 0], sizes = [1, 512], strides = [1, 1]} : vector<9x512xf32> to vector<1x512xf32>
    %129 = vector.broadcast %128 : vector<1x512xf32> to vector<8x512xf32>
    %130 = arith.mulf %127, %129 : vector<8x512xf32>
    %c497_i32 = arith.constant 497 : i32
    %131 = tpu.dynamic_rotate %106 by %c497_i32 dim 1 : vector<8x512xf32>, i32 -> vector<8x512xf32>
    %132 = vector.extract_strided_slice %11 {offsets = [6, 0], sizes = [1, 512], strides = [1, 1]} : vector<9x512xf32> to vector<1x512xf32>
    %133 = vector.broadcast %132 : vector<1x512xf32> to vector<8x512xf32>
    %134 = arith.mulf %131, %133 : vector<8x512xf32>
    %c496_i32 = arith.constant 496 : i32
    %135 = tpu.dynamic_rotate %106 by %c496_i32 dim 1 : vector<8x512xf32>, i32 -> vector<8x512xf32>
    %136 = vector.extract_strided_slice %11 {offsets = [7, 0], sizes = [1, 512], strides = [1, 1]} : vector<9x512xf32> to vector<1x512xf32>
    %137 = vector.broadcast %136 : vector<1x512xf32> to vector<8x512xf32>
    %138 = arith.mulf %135, %137 : vector<8x512xf32>
    %c495_i32 = arith.constant 495 : i32
    %139 = tpu.dynamic_rotate %106 by %c495_i32 dim 1 : vector<8x512xf32>, i32 -> vector<8x512xf32>
    %140 = vector.extract_strided_slice %11 {offsets = [8, 0], sizes = [1, 512], strides = [1, 1]} : vector<9x512xf32> to vector<1x512xf32>
    %141 = vector.broadcast %140 : vector<1x512xf32> to vector<8x512xf32>
    %142 = arith.mulf %139, %141 : vector<8x512xf32>
    %143 = tpu.concatenate %111, %115, %119, %123, %126, %130, %134, %138, %142 in 0 : vector<8x512xf32>, vector<8x512xf32>, vector<8x512xf32>, vector<8x512xf32>, vector<8x512xf32>, vector<8x512xf32>, vector<8x512xf32>, vector<8x512xf32>, vector<8x512xf32> -> vector<72x512xf32>
    %144 = arith.truncf %143 : vector<72x512xf32> to vector<72x512xbf16>
    %cst_30 = arith.constant dense<0.000000e+00> : vector<4x512xf32>
    %145 = tpu.matmul %107, %144, %cst_30 {dimension_numbers = #tpu.dot_dimension_numbers<[1], [0], [0], [1], [0, 0, 1, 1], [], []>} : vector<4x72xbf16>, vector<72x512xbf16>, vector<4x512xf32> -> vector<4x512xf32>
    %146 = vector.broadcast %6 : vector<4x1xf32> to vector<4x512xf32>
    %147 = arith.addf %145, %146 : vector<4x512xf32>
    %cst_31 = arith.constant dense<0.000000e+00> : vector<4xf32>
    %148 = vector.multi_reduction <add>, %147, %cst_31 [1] : vector<4x512xf32> to vector<4xf32>
    %149 = vector.shape_cast %148 : vector<4xf32> to vector<4x1xf32>
    %cst_32 = arith.constant 5.120000e+02 : f32
    %150 = vector.broadcast %cst_32 : f32 to vector<4x1xf32>
    %151 = arith.divf %149, %150 : vector<4x1xf32>
    %152 = vector.broadcast %151 : vector<4x1xf32> to vector<4x512xf32>
    %153 = arith.subf %147, %152 : vector<4x512xf32>
    %154 = arith.mulf %153, %153 : vector<4x512xf32>
    %cst_33 = arith.constant dense<0.000000e+00> : vector<4xf32>
    %155 = vector.multi_reduction <add>, %154, %cst_33 [1] : vector<4x512xf32> to vector<4xf32>
    %156 = vector.shape_cast %155 : vector<4xf32> to vector<4x1xf32>
    %cst_34 = arith.constant 5.120000e+02 : f32
    %157 = vector.broadcast %cst_34 : f32 to vector<4x1xf32>
    %158 = arith.divf %156, %157 : vector<4x1xf32>
    %159 = vector.broadcast %151 : vector<4x1xf32> to vector<4x512xf32>
    %160 = arith.subf %147, %159 : vector<4x512xf32>
    %161 = vector.broadcast %7 : vector<4x1xf32> to vector<4x512xf32>
    %162 = arith.mulf %161, %160 : vector<4x512xf32>
    %cst_35 = arith.constant 8.000000e-01 : f32
    %163 = vector.broadcast %cst_35 : f32 to vector<4x1xf32>
    %164 = arith.addf %158, %163 : vector<4x1xf32>
    %165 = math.rsqrt %164 : vector<4x1xf32>
    %166 = vector.broadcast %165 : vector<4x1xf32> to vector<4x512xf32>
    %167 = arith.mulf %162, %166 : vector<4x512xf32>
    %168 = vector.broadcast %8 : vector<4x1xf32> to vector<4x512xf32>
    %169 = arith.addf %167, %168 : vector<4x512xf32>
    %cst_36 = arith.constant 0.000000e+00 : f32
    %170 = vector.broadcast %cst_36 : f32 to vector<4x512xf32>
    %171 = arith.cmpf ogt, %169, %170 : vector<4x512xf32>
    %cst_37 = arith.constant 2.000000e-01 : f32
    %172 = vector.broadcast %cst_37 : f32 to vector<4x512xf32>
    %173 = arith.mulf %172, %169 : vector<4x512xf32>
    %174 = arith.select %171, %169, %173 : vector<4x512xi1>, vector<4x512xf32>
    %c0_38 = arith.constant 0 : index
    %c0_39 = arith.constant 0 : index
    %175 = vector.load %arg5[%c0_38, %c0_39] : memref<3x36xbf16, #tpu.memory_space<vmem>>, vector<3x36xbf16>
    %c17_i32_40 = arith.constant 17 : i32
    %176 = tpu.dynamic_rotate %174 by %c17_i32_40 dim 1 : vector<4x512xf32>, i32 -> vector<4x512xf32>
    %177 = vector.extract_strided_slice %11 {offsets = [0, 0], sizes = [1, 512], strides = [1, 1]} : vector<9x512xf32> to vector<1x512xf32>
    %178 = vector.broadcast %177 : vector<1x512xf32> to vector<4x512xf32>
    %179 = arith.mulf %176, %178 : vector<4x512xf32>
    %c16_i32_41 = arith.constant 16 : i32
    %180 = tpu.dynamic_rotate %174 by %c16_i32_41 dim 1 : vector<4x512xf32>, i32 -> vector<4x512xf32>
    %181 = vector.extract_strided_slice %11 {offsets = [1, 0], sizes = [1, 512], strides = [1, 1]} : vector<9x512xf32> to vector<1x512xf32>
    %182 = vector.broadcast %181 : vector<1x512xf32> to vector<4x512xf32>
    %183 = arith.mulf %180, %182 : vector<4x512xf32>
    %c15_i32_42 = arith.constant 15 : i32
    %184 = tpu.dynamic_rotate %174 by %c15_i32_42 dim 1 : vector<4x512xf32>, i32 -> vector<4x512xf32>
    %185 = vector.extract_strided_slice %11 {offsets = [2, 0], sizes = [1, 512], strides = [1, 1]} : vector<9x512xf32> to vector<1x512xf32>
    %186 = vector.broadcast %185 : vector<1x512xf32> to vector<4x512xf32>
    %187 = arith.mulf %184, %186 : vector<4x512xf32>
    %c1_i32_43 = arith.constant 1 : i32
    %188 = tpu.dynamic_rotate %174 by %c1_i32_43 dim 1 : vector<4x512xf32>, i32 -> vector<4x512xf32>
    %189 = vector.extract_strided_slice %11 {offsets = [3, 0], sizes = [1, 512], strides = [1, 1]} : vector<9x512xf32> to vector<1x512xf32>
    %190 = vector.broadcast %189 : vector<1x512xf32> to vector<4x512xf32>
    %191 = arith.mulf %188, %190 : vector<4x512xf32>
    %192 = vector.extract_strided_slice %11 {offsets = [4, 0], sizes = [1, 512], strides = [1, 1]} : vector<9x512xf32> to vector<1x512xf32>
    %193 = vector.broadcast %192 : vector<1x512xf32> to vector<4x512xf32>
    %194 = arith.mulf %174, %193 : vector<4x512xf32>
    %c511_i32_44 = arith.constant 511 : i32
    %195 = tpu.dynamic_rotate %174 by %c511_i32_44 dim 1 : vector<4x512xf32>, i32 -> vector<4x512xf32>
    %196 = vector.extract_strided_slice %11 {offsets = [5, 0], sizes = [1, 512], strides = [1, 1]} : vector<9x512xf32> to vector<1x512xf32>
    %197 = vector.broadcast %196 : vector<1x512xf32> to vector<4x512xf32>
    %198 = arith.mulf %195, %197 : vector<4x512xf32>
    %c497_i32_45 = arith.constant 497 : i32
    %199 = tpu.dynamic_rotate %174 by %c497_i32_45 dim 1 : vector<4x512xf32>, i32 -> vector<4x512xf32>
    %200 = vector.extract_strided_slice %11 {offsets = [6, 0], sizes = [1, 512], strides = [1, 1]} : vector<9x512xf32> to vector<1x512xf32>
    %201 = vector.broadcast %200 : vector<1x512xf32> to vector<4x512xf32>
    %202 = arith.mulf %199, %201 : vector<4x512xf32>
    %c496_i32_46 = arith.constant 496 : i32
    %203 = tpu.dynamic_rotate %174 by %c496_i32_46 dim 1 : vector<4x512xf32>, i32 -> vector<4x512xf32>
    %204 = vector.extract_strided_slice %11 {offsets = [7, 0], sizes = [1, 512], strides = [1, 1]} : vector<9x512xf32> to vector<1x512xf32>
    %205 = vector.broadcast %204 : vector<1x512xf32> to vector<4x512xf32>
    %206 = arith.mulf %203, %205 : vector<4x512xf32>
    %c495_i32_47 = arith.constant 495 : i32
    %207 = tpu.dynamic_rotate %174 by %c495_i32_47 dim 1 : vector<4x512xf32>, i32 -> vector<4x512xf32>
    %208 = vector.extract_strided_slice %11 {offsets = [8, 0], sizes = [1, 512], strides = [1, 1]} : vector<9x512xf32> to vector<1x512xf32>
    %209 = vector.broadcast %208 : vector<1x512xf32> to vector<4x512xf32>
    %210 = arith.mulf %207, %209 : vector<4x512xf32>
    %211 = tpu.concatenate %179, %183, %187, %191, %194, %198, %202, %206, %210 in 0 : vector<4x512xf32>, vector<4x512xf32>, vector<4x512xf32>, vector<4x512xf32>, vector<4x512xf32>, vector<4x512xf32>, vector<4x512xf32>, vector<4x512xf32>, vector<4x512xf32> -> vector<36x512xf32>
    %212 = arith.truncf %211 : vector<36x512xf32> to vector<36x512xbf16>
    %cst_48 = arith.constant dense<0.000000e+00> : vector<3x512xf32>
    %213 = tpu.matmul %175, %212, %cst_48 {dimension_numbers = #tpu.dot_dimension_numbers<[1], [0], [0], [1], [0, 0, 1, 1], [], []>} : vector<3x36xbf16>, vector<36x512xbf16>, vector<3x512xf32> -> vector<3x512xf32>
    %214 = vector.broadcast %9 : vector<3x1xf32> to vector<3x512xf32>
    %215 = arith.addf %213, %214 : vector<3x512xf32>
    %216 = math.tanh %215 : vector<3x512xf32>
    %217 = vector.extract_strided_slice %216 {offsets = [0, 0], sizes = [3, 256], strides = [1, 1]} : vector<3x512xf32> to vector<3x256xf32>
    %c0_49 = arith.constant 0 : index
    %c0_50 = arith.constant 0 : index
    %218 = vector.load %arg9[%c0_49, %c0_50] : memref<6x256xf32, #tpu.memory_space<vmem>>, vector<3x256xf32>
    tpu.vector_store %arg9[%c0_49, %c0_50], %217 {strides = array<i32>} : memref<6x256xf32, #tpu.memory_space<vmem>>, vector<3x256xf32>,
    %219 = vector.extract_strided_slice %216 {offsets = [0, 256], sizes = [3, 256], strides = [1, 1]} : vector<3x512xf32> to vector<3x256xf32>
    %c3 = arith.constant 3 : index
    %c0_51 = arith.constant 0 : index
    %220 = vector.load %arg9[%c3, %c0_51] : memref<6x256xf32, #tpu.memory_space<vmem>>, vector<3x256xf32>
    tpu.vector_store %arg9[%c3, %c0_51], %219 {strides = array<i32>} : memref<6x256xf32, #tpu.memory_space<vmem>>, vector<3x256xf32>,
    return
  }
}

</mosaic_0001>

<bundles_post_ra>
// kernel: generator_forward.1
= control target key start
LH: loop header
LB: loop body
LE: loop exit
PB: predicated region body
PF: predicated region fallthrough
CT: control target
= control target key end

     0   :  { %vm45_vm0 = vcmask 261120   ;;  %v2553_v1 = vmov 0   ;;  %v1471_v4 = vmov 1   ;;  %v1472_v10 = vmov 0.0|0.0   ;;  %s1476_s20 = smov 9   ;;  %s1477_s21 = smov 7   ;;  %s2543_s0 = inlined_call_operand.vmem [shape: f32[8,32], index: 0, kind: input, shape index: {}]   ;;  %s2544_s8 = inlined_call_operand.vmem [shape: f32[8,9], index: 8, kind: input, shape index: {}]   ;;  %s2545_s1 = inlined_call_operand.vmem [shape: f32[32,128], index: 1, kind: input, shape index: {}]   ;;  %s2546_s6 = inlined_call_operand.vmem [shape: f32[9,128], index: 6, kind: input, shape index: {}]   ;;  %s2547_s3 = inlined_call_operand.vmem [shape: bf16[8,72], index: 3, kind: input, shape index: {}]   ;;  %s2548_s2 = inlined_call_operand.vmem [shape: f32[128,512], index: 2, kind: input, shape index: {}]   ;;  %s2549_s7 = inlined_call_operand.vmem [shape: f32[9,512], index: 7, kind: input, shape index: {}]   ;;  %s2550_s4 = inlined_call_operand.vmem [shape: bf16[4,72], index: 4, kind: input, shape index: {}]   ;;  %s2551_s5 = inlined_call_operand.vmem [shape: bf16[3,36], index: 5, kind: input, shape index: {}]   ;;  %s2552_s9 = inlined_call_operand.vmem [shape: f32[6,256], index: 9, kind: output, shape index: {}]  }
   0x1   :  { %v44_v0 = vld [vmem:[%s2543_s0] sm:$0xff]  ;;  %1446 = vset.pattern.permute.xlu1 %v2553_v1  ;;  %1350 = vmatprep.subr.bf16.mxu1 %v1472_v10  ;;  %v72_v12 = vld [vmem:[%s2545_s1 + $0x8] sm:$0xff]  ;;  %v73_v14 = vld [vmem:[%s2545_s1 + $0x10] sm:$0xff]  ;;  %vm1473_vm1 = vmmov 0   ;;  %v1474_v17 = vmov 0.0   ;;  %s1478_s22 = smov 119   ;;  %v151_v30 = vlaneseq }
   0x2   :  { %v1553_v2 = vld [vmem:[%s2544_s8] sm:$0xff]  ;;  %v46_v3 = vsel %vm45_vm0, %v44_v0, 0.0  ;;  %v74_v15 = vld [vmem:[%s2545_s1 + $0x18] sm:$0xff]  ;;  %1333 = vmatprep.mubr.msk.f32.mxu1 %vm1473_vm1, %v1474_v17  ;;  %420 = vmatprep.mubr.f32.mxu0 %v1474_v17  ;;  %s1479_s23 = smov 1   ;;  %s1480_s24 = smov 127   ;;  %v1482_v29 = vmov 2  }
   0x3   :  { %59 = vperm.xlu1 %1446, %v1553_v2   ;;  %47 = vadd.xlane.f32.xlu0 %v46_v3  ;;  %v71_v11 = vld [vmem:[%s2545_s1] sm:$0xff]  ;;  %v1354_v16 = vpack.c.bf16 %v74_v15, %v73_v14  ;;  %s1475_s1 = smov 8   ;;  %s1481_s25 = smov 121   ;;  %v152_v31 = vshrl.u32 %v151_v30, 7  ;;  %v1300_v62 = vld [vmem:[%s2546_s6 + $0x8] ss:$0 sm:$0xff] }
   0x4   :  { %v1351_v13 = vpack.c.bf16 %v72_v12, %v71_v11  ;;  %s1483_s26 = smov 120   ;;  %v34_v34 = vld [vmem:[%s2546_s6] sm:$0xff]  ;;  %vm223_vm2 = vcmask 1043456   ;;  %vm219_vm3 = vcmask 588800   ;;  %v1484_v12 = vmov 3   ;;  %s1491_s27 = smov 111  }
   0x5   :  { %v1582_v32 = vsub.s32 1, %v152_v31  ;;  %v1584_v33 = vsub.s32 0, %v152_v31  ;;  %v1591_v41 = vsub.s32 2, %v152_v31  ;;  %v1593_v42 = vsub.s32 3, %v152_v31  ;;  %v148_v11 = vld [vmem:[%s2547_s3] sm:$0xf]  ;;  %1449 = vset.pattern.permute.xlu0 %v1484_v12 }
   0x6   :  { %1352 = vmatpush3.bf16.msra.mxu1 %v1351_v13  ;;  %v1597_v47 = vsub.s32 4, %v152_v31  ;;  %v1599_v48 = vsub.s32 5, %v152_v31  ;;  %v1604_v58 = vsub.s32 6, %v152_v31  ;;  %v1606_v59 = vsub.s32 7, %v152_v31  ;;  %v298_v31 = vld [vmem:[%s2548_s2 + $0x30] sm:$0xff]  ;;  %v316_v12 = vld [vmem:[%s2548_s2 + $0xc0] sm:$0xff] }
   0x7   :  { %1447 = vset.pattern.permute.xlu1 %v1471_v4  ;;  %1353 = vmatprep.subr.bf16.mxu1 %v1472_v10  ;;  %v161_v35 = vrot.slane %v34_v34, %v1582_v32  ;;  %v154_v36 = vrot.slane %v34_v34, %v1584_v33  ;;  %v168_v45 = vrot.slane %v34_v34, %v1591_v41 }
   0x8   :  { %67 = vperm.xlu1 %1447, %v1553_v2   ;;  %v175_v46 = vrot.slane %v34_v34, %v1593_v42  ;;  %v180_v52 = vrot.slane %v34_v34, %v1597_v47  ;;  %v187_v53 = vrot.slane %v34_v34, %v1599_v48  ;;  %v201_v3 = vrot.slane %v34_v34, %v1606_v59 }
   0xa   :  { %1355 = vmatpush3.bf16.msra.mxu1 %v1354_v16 }
   0xb   :  { %1336 = vmatprep.subr.bf16.mxu1 %v1474_v17 }
   0xc   :  { %1448 = vset.pattern.permute.xlu1 %v1482_v29  ;;  %v294_v29 = vld [vmem:[%s2548_s2 + $0x10] sm:$0xff] }
  0x82   :  { %v60_v21 = vpop.permute.xlu1 %59 }
  0x87   :  { %v68_v24 = vpop.permute.xlu1 %67 }
  0x90   :  { %v48_v5 = vpop.xlane.xlu0 %47 }
  0x91   :  { %v50_v6 = vmul.f32 0.03125, %v48_v5 }
  0x93   :  { %v51_v7 = vsub.f32 %v44_v0, %v50_v6  ;;  %v194_v0 = vrot.slane %v34_v34, %v1604_v58  ;;  %v301_v34 = vld [vmem:[%s2548_s2 + $0x48] sm:$0xff] }
  0x95   :  { %v52_v8 = vmul.f32 %v51_v7, %v51_v7  ;;  %v62_v22 = vmul.f32 %v60_v21, %v51_v7  ;;  %v293_v21 = vld [vmem:[%s2548_s2 + $0x8] sm:$0xff] }
  0x97   :  { %v53_v9 = vsel %vm45_vm0, %v52_v8, 0.0 }
  0x98   :  { %54 = vadd.xlane.f32.xlu0 %v53_v9 }
 0x125   :  { %v55_v18 = vpop.xlane.xlu0 %54 }
 0x126   :  { %v56_v19 = vmul.f32 0.03125, %v55_v18 }
 0x128   :  { %v63_v20 = vadd.f32 1e-05, %v56_v19 }
 0x12a   :  { %1455 = vrsqrt.f32 %v63_v20  ;;  %v1485_v20 = vmov 4  }
 0x134   :  { %v1456_v23 = vpop.eup %1455 }
 0x135   :  { %v65_v25 = vmul.f32 %v1456_v23, %v62_v22  ;;  %v295_v22 = vld [vmem:[%s2548_s2 + $0x18] sm:$0xff] }
 0x137   :  { %v70_v26 = vadd.f32 %v68_v24, %v65_v25  ;;  %v299_v24 = vld [vmem:[%s2548_s2 + $0x38] sm:$0xff]  ;;  %v292_v25 = vld [vmem:[%s2548_s2] sm:$0xff] }
 0x139   :  { %1334 = vmatmul.mubr.msk.f32.vlgmr.msra.gmra.mrb[0].mxu1 %vm45_vm0, %v70_v26  ;;  %v296_v26 = vld [vmem:[%s2548_s2 + $0x20] sm:$0xff] }
 0x13a   :  { %1346 = vmatprep.mubr.msk.bf16.mxu1 %vm1473_vm1, %v1474_v17  ;;  %vm1186_vm1 = vcmask 1041408  }
 0x20c   :  { %v144_v27 = vpop.f32.mrb[0].mxu1 }
 0x20d   :  { %156 = vrot.lane.b32.xlu1 %v144_v27, %s1475_s1  ;;  %149 = vrot.lane.b32.xlu0 %v144_v27, %s1476_s20  ;;  %v1335_v28 = vpop.f32.mrb[1].mxu1  ;;  %v181_v56 = vmul.f32 %v180_v52, %v144_v27 }
 0x20e   :  { %v1358_v28 = vpack.c.bf16 %v296_v26, %v292_v25  ;;  %v328_v25 = vld [vmem:[%s2548_s2 + $0x120] sm:$0xff] }
 0x211   :  { %163 = vrot.lane.b32.xlu1 %v144_v27, %s1477_s21  ;;  %203 = vrot.lane.b32.xlu0 %v144_v27, %s1478_s22  ;;  %s1487_s21 = smov 16   ;;  %s1488_s22 = smov 113  }
 0x215   :  { %170 = vrot.lane.b32.xlu1 %v144_v27, %s1479_s23 }
 0x219   :  { %182 = vrot.lane.b32.xlu1 %v144_v27, %s1480_s24 }
 0x21d   :  { %189 = vrot.lane.b32.xlu1 %v144_v27, %s1481_s25  ;;  %s1489_s25 = smov 15  }
 0x221   :  { %196 = vrot.lane.b32.xlu1 %v144_v27, %s1483_s26  ;;  %v1388_v27 = vpack.c.bf16 %v299_v24, %v295_v22  ;;  %v324_v24 = vld [vmem:[%s2548_s2 + $0x100] sm:$0xff]  ;;  %s1490_s26 = smov 112  }
 0x225   :  { %216 = vperm.xlu1 %1448, %v1553_v2  }
 0x229   :  { %1450 = vset.pattern.permute.xlu1 %v1485_v20  ;;  %v325_v20 = vld [vmem:[%s2548_s2 + $0x108] sm:$0xff] }
 0x27f   :  { %v157_v37 = vpop.permute.xlu1 %156  ;;  %v150_v38 = vpop.permute.xlu0 %149 }
 0x280   :  { %v162_v39 = vmul.f32 %v161_v35, %v157_v37  ;;  %v155_v40 = vmul.f32 %v154_v36, %v150_v38  ;;  %v1390_v35 = vpack.c.bf16 %v298_v31, %v294_v29  ;;  %v305_v36 = vld [vmem:[%s2548_s2 + $0x68] sm:$0xff]  ;;  %v303_v37 = vld [vmem:[%s2548_s2 + $0x58] sm:$0xff]  ;;  %v330_v29 = vld [vmem:[%s2548_s2 + $0x130] sm:$0xff] }
 0x281   :  { %v307_v38 = vld [vmem:[%s2548_s2 + $0x78] sm:$0xff]  ;;  %v333_v31 = vld [vmem:[%s2548_s2 + $0x148] sm:$0xff] }
 0x282   :  { %v210_v43 = vpack.c.bf16 %v162_v39, %v155_v40  ;;  %v1360_v39 = vpack.c.bf16 %v305_v36, %v301_v34  ;;  %v1392_v40 = vpack.c.bf16 %v307_v38, %v303_v37  ;;  %v335_v36 = vld [vmem:[%s2548_s2 + $0x158] sm:$0xff] }
 0x283   :  { %v164_v44 = vpop.permute.xlu1 %163  ;;  %v204_v63 = vpop.permute.xlu0 %203  ;;  %v339_v37 = vld [vmem:[%s2548_s2 + $0x178] sm:$0xff] }
 0x284   :  { %1337 = vmatpush3.bf16.msra.mxu1 %v210_v43  ;;  %v169_v50 = vmul.f32 %v168_v45, %v164_v44  ;;  %v209_v4 = vmul.f32 %v1300_v62, %v204_v63  ;;  %v300_v43 = vld [vmem:[%s2548_s2 + $0x40] sm:$0xff]  ;;  %v302_v45 = vld [vmem:[%s2548_s2 + $0x50] sm:$0xff] }
 0x285   :  { %1338 = vmatprep.subr.bf16.mxu1 %v1474_v17  ;;  %v304_v44 = vld [vmem:[%s2548_s2 + $0x60] sm:$0xff]  ;;  %v314_v62 = vld [vmem:[%s2548_s2 + $0xb0] sm:$0xff] }
 0x286   :  { %v214_v9 = vpack.c.bf16 %v209_v4, %v209_v4 }
 0x287   :  { %v171_v49 = vpop.permute.xlu1 %170 }
 0x288   :  { %v176_v51 = vmul.f32 %v175_v46, %v171_v49  ;;  %v225_v10 = vsel %vm223_vm2, %v214_v9, 0  ;;  %v1362_v46 = vpack.c.bf16 %v304_v44, %v300_v43  ;;  %v306_v49 = vld [vmem:[%s2548_s2 + $0x70] sm:$0xff]  ;;  %v319_v9 = vld [vmem:[%s2548_s2 + $0xd8] sm:$0xff]  ;;  %v336_v43 = vld [vmem:[%s2548_s2 + $0x160] sm:$0xff] }
 0x289   :  { %v1394_v52 = vpack.c.bf16 %v306_v49, %v302_v45  ;;  %v334_v44 = vld [vmem:[%s2548_s2 + $0x150] sm:$0xff]  ;;  %v341_v49 = vld [vmem:[%s2548_s2 + $0x188] sm:$0xff] }
 0x28a   :  { %v211_v54 = vpack.c.bf16 %v176_v51, %v169_v50  ;;  %v309_v50 = vld [vmem:[%s2548_s2 + $0x88] sm:$0xff] }
 0x28b   :  { %v183_v55 = vpop.permute.xlu1 %182  ;;  %v313_v51 = vld [vmem:[%s2548_s2 + $0xa8] sm:$0xff] }
 0x28c   :  { %v188_v57 = vmul.f32 %v187_v53, %v183_v55  ;;  %1339 = vmatpush3.bf16.msra.mxu1 %v211_v54  ;;  %v1364_v53 = vpack.c.bf16 %v313_v51, %v309_v50  ;;  %v311_v54 = vld [vmem:[%s2548_s2 + $0x98] sm:$0xff]  ;;  %v345_v50 = vld [vmem:[%s2548_s2 + $0x1a8] sm:$0xff] }
 0x28d   :  { %1340 = vmatprep.subr.bf16.mxu1 %v1474_v17  ;;  %v315_v55 = vld [vmem:[%s2548_s2 + $0xb8] sm:$0xff] }
 0x28e   :  { %v212_v60 = vpack.c.bf16 %v188_v57, %v181_v56  ;;  %v308_v56 = vld [vmem:[%s2548_s2 + $0x80] sm:$0xff]  ;;  %v1396_v57 = vpack.c.bf16 %v315_v55, %v311_v54  ;;  %v347_v54 = vld [vmem:[%s2548_s2 + $0x1b8] sm:$0xff] }
 0x28f   :  { %v190_v61 = vpop.permute.xlu1 %189  ;;  %v340_v55 = vld [vmem:[%s2548_s2 + $0x180] sm:$0xff] }
 0x290   :  { %1341 = vmatpush3.bf16.msra.mxu1 %v212_v60  ;;  %v195_v6 = vmul.f32 %v194_v0, %v190_v61  ;;  %v312_v60 = vld [vmem:[%s2548_s2 + $0xa0] sm:$0xff]  ;;  %v310_v61 = vld [vmem:[%s2548_s2 + $0x90] sm:$0xff] }
 0x291   :  { %1342 = vmatprep.subr.bf16.mxu1 %v1474_v17  ;;  %v1366_v63 = vpack.c.bf16 %v312_v60, %v308_v56  ;;  %v1398_v0 = vpack.c.bf16 %v314_v62, %v310_v61  ;;  %v342_v60 = vld [vmem:[%s2548_s2 + $0x190] sm:$0xff] }
 0x292   :  { %v346_v61 = vld [vmem:[%s2548_s2 + $0x1b0] sm:$0xff] }
 0x293   :  { %v197_v5 = vpop.permute.xlu1 %196 }
 0x294   :  { %v202_v7 = vmul.f32 %v201_v3, %v197_v5 }
 0x296   :  { %v213_v8 = vpack.c.bf16 %v202_v7, %v195_v6  ;;  %v317_v7 = vld [vmem:[%s2548_s2 + $0xc8] sm:$0xff] }
 0x298   :  { %1343 = vmatpush3.bf16.msra.mxu1 %v213_v8  ;;  %v321_v8 = vld [vmem:[%s2548_s2 + $0xe8] sm:$0xff] }
 0x299   :  { %1344 = vmatprep.subr.bf16.mxu1 %v1474_v17 }
 0x29c   :  { %1345 = vmatpush3.bf16.msra.mxu1 %v225_v10  ;;  %v1368_v10 = vpack.c.bf16 %v321_v8, %v317_v7  ;;  %v355_v7 = vld [vmem:[%s2548_s2 + $0x1f8] sm:$0xff]  ;;  %v348_v8 = vld [vmem:[%s2548_s2 + $0x1c0] sm:$0xff] }
 0x29d   :  { %1389 = vmatprep.subr.bf16.mxu1 %v1388_v27  ;;  %v1374_v27 = vpack.c.bf16 %v328_v25, %v324_v24 }
 0x29f   :  { %1347 = vmatmul.mubr.msk.bf16.vlgmr.msra.gmra.mrb[4].mxu1 %vm219_vm3, %v148_v11  ;;  %v323_v11 = vld [vmem:[%s2548_s2 + $0xf8] sm:$0xff] }
 0x2a0   :  { %491 = vmatprep.mubr.f32.mxu1 %v1474_v17  ;;  %v297_v17 = vld [vmem:[%s2548_s2 + $0x28] sm:$0xff]  ;;  %1391 = vmatpush1.bf16.msra.mxu1 %v1390_v35 }
 0x2a1   :  { %v1356_v23 = vpack.c.bf16 %v297_v17, %v293_v21  ;;  %1393 = vmatprep.subr.bf16.mxu1 %v1392_v40  ;;  %v329_v21 = vld [vmem:[%s2548_s2 + $0x128] sm:$0xff]  ;;  %v327_v17 = vld [vmem:[%s2548_s2 + $0x118] sm:$0xff]  ;;  %v332_v40 = vld [vmem:[%s2548_s2 + $0x140] sm:$0xff] }
 0x2a2   :  { %v1372_v22 = vpack.c.bf16 %v329_v21, %v325_v20  ;;  %v337_v35 = vld [vmem:[%s2548_s2 + $0x168] sm:$0xff]  ;;  %v1378_v45 = vpack.c.bf16 %v336_v43, %v332_v40 }
 0x2a3   :  { %1357 = vmatprep.subr.bf16.mxu0 %v1356_v23  ;;  %v331_v23 = vld [vmem:[%s2548_s2 + $0x138] sm:$0xff]  ;;  %v1376_v38 = vpack.c.bf16 %v337_v35, %v333_v31 }
 0x2a4   :  { %v217_v13 = vpop.permute.xlu1 %216  ;;  %1359 = vmatpush1.bf16.msra.mxu0 %v1358_v28  ;;  %1395 = vmatpush1.bf16.msra.mxu1 %v1394_v52  ;;  %v1404_v26 = vpack.c.bf16 %v331_v23, %v327_v17  ;;  %v326_v28 = vld [vmem:[%s2548_s2 + $0x110] sm:$0xff]  ;;  %v1380_v52 = vpack.c.bf16 %v345_v50, %v341_v49 }
 0x2a5   :  { %1361 = vmatprep.subr.bf16.mxu0 %v1360_v39  ;;  %1397 = vmatprep.subr.bf16.mxu1 %v1396_v57  ;;  %v1406_v34 = vpack.c.bf16 %v330_v29, %v326_v28  ;;  %v1408_v39 = vpack.c.bf16 %v339_v37, %v335_v36  ;;  %v344_v57 = vld [vmem:[%s2548_s2 + $0x1a0] sm:$0xff]  ;;  %v1492_v29 = vmov 5  }
 0x2a6   :  { %v1382_v62 = vpack.c.bf16 %v344_v57, %v340_v55  ;;  %v1940_v55 = vld [vmem:[%s2549_s7 + $0x8] sm:$0xff] }
 0x2a8   :  { %1363 = vmatpush1.bf16.msra.mxu0 %v1362_v46  ;;  %1399 = vmatpush1.bf16.msra.mxu1 %v1398_v0  ;;  %v338_v46 = vld [vmem:[%s2548_s2 + $0x170] sm:$0xff]  ;;  %v349_v0 = vld [vmem:[%s2548_s2 + $0x1c8] sm:$0xff] }
 0x2a9   :  { %1365 = vmatprep.subr.bf16.mxu0 %v1364_v53  ;;  %v1410_v51 = vpack.c.bf16 %v338_v46, %v334_v44  ;;  %v343_v53 = vld [vmem:[%s2548_s2 + $0x198] sm:$0xff] }
 0x2aa   :  { %v1412_v56 = vpack.c.bf16 %v347_v54, %v343_v53  ;;  %v1930_v53 = vld [vmem:[%s2549_s7] sm:$0xff]  ;;  %v1935_v54 = vld [vmem:[%s2549_s7 + $0x18] sm:$0xff] }
 0x2ab   :  { %2567 = vst [vmem:[#allocation4_spill] sm:$0xff] %v1935_v54 }
 0x2ac   :  { %1367 = vmatpush1.bf16.msra.mxu0 %v1366_v63  ;;  %v1414_v63 = vpack.c.bf16 %v346_v61, %v342_v60  ;;  %v1951_v60 = vrot.slane %v1935_v54, %v1597_v47  ;;  %v1955_v61 = vrot.slane %v1940_v55, %v1597_v47 }
 0x2ad   :  { %1369 = vmatprep.subr.bf16.mxu0 %v1368_v10 }
 0x372   :  { %v261_v14 = vpop.f32.mrb[4].mxu1 }
 0x373   :  { %v262_v15 = vadd.f32 %v261_v14, %v217_v13  ;;  %v1348_v16 = vpop.f32.mrb[5].mxu1  ;;  %v320_v13 = vld [vmem:[%s2548_s2 + $0xe0] sm:$0xff]  ;;  %v1400_v14 = vpack.c.bf16 %v323_v11, %v319_v9 }
 0x374   :  { %v264_v18 = vpop.f32.mrb[6].mxu1  ;;  %v318_v16 = vld [vmem:[%s2548_s2 + $0xd0] sm:$0xff]  ;;  %v352_v9 = vld [vmem:[%s2548_s2 + $0x1e0] sm:$0xff] }
 0x375   :  { %267 = vadd.xlane.f32.xlu0 %v262_v15  ;;  %v1349_v19 = vpop.f32.mrb[7].mxu1  ;;  %v322_v18 = vld [vmem:[%s2548_s2 + $0xf0] sm:$0xff]  ;;  %1401 = vmatprep.subr.bf16.mxu1 %v1400_v14  ;;  %v1386_v11 = vpack.c.bf16 %v352_v9, %v348_v8 }
 0x376   :  { %v1402_v19 = vpack.c.bf16 %v322_v18, %v318_v16 }
 0x378   :  { %1403 = vmatpush1.bf16.msra.mxu1 %v1402_v19 }
 0x379   :  { %1405 = vmatprep.subr.bf16.mxu1 %v1404_v26 }
 0x37c   :  { %1407 = vmatpush1.bf16.msra.mxu1 %v1406_v34 }
 0x37d   :  { %1409 = vmatprep.subr.bf16.mxu1 %v1408_v39 }
 0x380   :  { %1411 = vmatpush1.bf16.msra.mxu1 %v1410_v51 }
 0x381   :  { %1413 = vmatprep.subr.bf16.mxu1 %v1412_v56 }
 0x384   :  { %1415 = vmatpush1.bf16.msra.mxu1 %v1414_v63  ;;  %v1963_v63 = vrot.slane %v1935_v54, %v1582_v32 }
 0x386   :  { %2569 = vst [vmem:[#allocation6_spill] sm:$0xff] %v1963_v63 }
 0x38b   :  { %277 = vperm.xlu0 %1449, %v1553_v2  }
 0x402   :  { %v268_v3 = vpop.xlane.xlu0 %267 }
 0x403   :  { %v270_v4 = vmul.f32 0.0078125, %v268_v3  ;;  %v353_v3 = vld [vmem:[%s2548_s2 + $0x1e8] sm:$0xff] }
 0x405   :  { %v1695_v5 = vsub.f32 %v262_v15, %v270_v4  ;;  %v1370_v15 = vpack.c.bf16 %v320_v13, %v316_v12  ;;  %v351_v4 = vld [vmem:[%s2548_s2 + $0x1d8] sm:$0xff]  ;;  %v350_v12 = vld [vmem:[%s2548_s2 + $0x1d0] sm:$0xff] }
 0x406   :  { %v1416_v10 = vpack.c.bf16 %v355_v7, %v351_v4  ;;  %v354_v13 = vld [vmem:[%s2548_s2 + $0x1f0] sm:$0xff]  ;;  %s1486_s2 = smov 17  }
 0x407   :  { %v272_v6 = vmul.f32 %v1695_v5, %v1695_v5  ;;  %1371 = vmatpush1.bf16.msra.mxu0 %v1370_v15  ;;  %v1418_v14 = vpack.c.bf16 %v354_v13, %v350_v12  ;;  %v1999_v12 = vrot.slane %v1930_v53, %v1593_v42  ;;  %v2003_v13 = vrot.slane %v1935_v54, %v1593_v42 }
 0x408   :  { %1373 = vmatprep.subr.bf16.mxu0 %v1372_v22  ;;  %1417 = vmatprep.subr.bf16.mxu1 %v1416_v10  ;;  %v1991_v10 = vrot.slane %v1940_v55, %v1584_v33 }
 0x409   :  { %273 = vadd.xlane.f32.xlu1 %v272_v6  ;;  %v1384_v6 = vpack.c.bf16 %v353_v3, %v349_v0  ;;  %1419 = vmatpush1.bf16.msra.mxu1 %v1418_v14  ;;  %v1968_v0 = vld [vmem:[%s2549_s7 + $0x10] sm:$0xff]  ;;  %v1973_v3 = vrot.slane %v1940_v55, %v1591_v41  ;;  %v2007_v14 = vrot.slane %v1940_v55, %v1582_v32 }
 0x40a   :  { %v278_v19 = vpop.permute.xlu0 %277  ;;  %v1977_v4 = vrot.slane %v1968_v0, %v1591_v41  ;;  %v1987_v9 = vrot.slane %v1968_v0, %v1593_v42  ;;  %2570 = vst [vmem:[#allocation7_spill] sm:$0xff] %v1991_v10 }
 0x40b   :  { %1375 = vmatpush1.bf16.msra.mxu0 %v1374_v27  ;;  %v280_v20 = vmul.f32 %v278_v19, %v1695_v5  ;;  %v2027_v19 = vrot.slane %v1930_v53, %v1584_v33 }
 0x40c   :  { %1377 = vmatprep.subr.bf16.mxu0 %v1376_v38 }
 0x40f   :  { %1379 = vmatpush1.bf16.msra.mxu0 %v1378_v45 }
 0x410   :  { %1381 = vmatprep.subr.bf16.mxu0 %v1380_v52  ;;  %v1925_v52 = vand.u32 127, %v151_v30  ;;  %v1947_v30 = vrot.slane %v1930_v53, %v1597_v47 }
 0x412   :  { %vm542_vm5 = vcmp.lt.s32.totalorder %v1925_v52, 16  ;;  %vm575_vm6 = vcmp.lt.s32.totalorder %v1925_v52, 15  ;;  %vm608_vm7 = vcmp.lt.s32.totalorder %v1925_v52, 1  ;;  %vm509_vm8 = vcmp.lt.s32.totalorder %v1925_v52, 17 }
 0x413   :  { %1383 = vmatpush1.bf16.msra.mxu0 %v1382_v62  ;;  %v1959_v62 = vrot.slane %v1930_v53, %v1582_v32  ;;  %vm661_vm9 = vcmp.lt.s32.totalorder %v1925_v52, 127  ;;  %vm694_vm10 = vcmp.lt.s32.totalorder %v1925_v52, 113  ;;  %vm727_vm11 = vcmp.lt.s32.totalorder %v1925_v52, 112 }
 0x414   :  { %1385 = vmatprep.subr.bf16.mxu0 %v1384_v6  ;;  %v1982_v6 = vrot.slane %v1940_v55, %v1593_v42  ;;  %v2023_v42 = vrot.slane %v1935_v54, %v1599_v48  ;;  %vm760_vm12 = vcmp.lt.s32.totalorder %v1925_v52, 111 }
 0x417   :  { %1387 = vmatpush1.bf16.msra.mxu0 %v1386_v11  ;;  %v1995_v11 = vrot.slane %v1968_v0, %v1584_v33 }
 0x41a   :  { %285 = vperm.xlu1 %1450, %v1553_v2  }
 0x41e   :  { %1451 = vset.pattern.permute.xlu1 %v1492_v29  ;;  %v2054_v29 = vrot.slane %v1930_v53, %v1599_v48 }
 0x496   :  { %v274_v15 = vpop.xlane.xlu1 %273 }
 0x497   :  { %v275_v16 = vmul.f32 0.0078125, %v274_v15  ;;  %v2011_v15 = vrot.slane %v1968_v0, %v1582_v32 }
 0x499   :  { %v281_v18 = vadd.f32 0.8, %v275_v16 }
 0x49a   :  { %v286_v17 = vpop.permute.xlu1 %285 }
 0x49b   :  { %1457 = vrsqrt.f32 %v281_v18  ;;  %v2019_v18 = vrot.slane %v1968_v0, %v1599_v48 }
 0x4a5   :  { %v1458_v21 = vpop.eup %1457 }
 0x4a6   :  { %v283_v22 = vmul.f32 %v1458_v21, %v280_v20 }
 0x4a8   :  { %v288_v23 = vadd.f32 %v286_v17, %v283_v22  ;;  %v2040_v22 = vrot.slane %v1935_v54, %v1584_v33 }
 0x4aa   :  { %v290_v24 = vmul.f32 0.2, %v288_v23  ;;  %vm289_vm4 = vcmp.gt.f32.partialorder %v288_v23, 0.0 }
 0x4ac   :  { %v291_v25 = vsel %vm289_vm4, %v288_v23, %v290_v24  ;;  %v2046_v24 = vrot.slane %v1930_v53, %v1591_v41 }
 0x4ad   :  { %421 = vmatmul.mubr.f32.vlgmr.msra.gmra.mrb[0].mxu0 %v291_v25  ;;  %492 = vmatmul.mubr.f32.vlgmr.msra.gmra.mrb[2].mxu1 %v291_v25  ;;  %v2050_v25 = vrot.slane %v1935_v54, %v1591_v41 }
 0x4ae   :  { %856 = vmatprep.mubr.bf16.mxu0 %v2553_v1  ;;  %897 = vmatprep.mubr.bf16.mxu1 %v2553_v1 }
 0x580   :  { %v1823_v26 = vpop.f32.mrb[0].mxu0  ;;  %v1825_v27 = vpop.f32.mrb[2].mxu1 }
 0x581   :  { %499 = vrot.lane.b32.xlu1 %v1823_v26, %s1486_s2  ;;  %v1829_v5 = vpop.f32.mrb[1].mxu0  ;;  %538 = vrot.lane.b32.xlu0 %v1825_v27, %s1487_s21  ;;  %v1833_v28 = vpop.f32.mrb[3].mxu1 }
 0x585   :  { %534 = vrot.lane.b32.xlu1 %v1823_v26, %s1487_s21  ;;  %604 = vrot.lane.b32.xlu0 %v1825_v27, %s1479_s23 }
 0x589   :  { %657 = vrot.lane.b32.xlu0 %v1825_v27, %s1480_s24  ;;  %503 = vrot.lane.b32.xlu1 %v1825_v27, %s1486_s2 }
 0x58d   :  { %690 = vrot.lane.b32.xlu0 %v1825_v27, %s1488_s22  ;;  %567 = vrot.lane.b32.xlu1 %v1823_v26, %s1489_s25 }
 0x591   :  { %723 = vrot.lane.b32.xlu0 %v1825_v27, %s1490_s26  ;;  %600 = vrot.lane.b32.xlu1 %v1823_v26, %s1479_s23 }
 0x595   :  { %719 = vrot.lane.b32.xlu0 %v1823_v26, %s1490_s26  ;;  %571 = vrot.lane.b32.xlu1 %v1825_v27, %s1489_s25 }
 0x599   :  { %653 = vrot.lane.b32.xlu1 %v1823_v26, %s1480_s24  ;;  %540 = vrot.lane.b32.xlu0 %v1833_v28, %s1487_s21 }
 0x59d   :  { %686 = vrot.lane.b32.xlu1 %v1823_v26, %s1488_s22  ;;  %569 = vrot.lane.b32.xlu0 %v1829_v5, %s1489_s25 }
 0x5a1   :  { %752 = vrot.lane.b32.xlu1 %v1823_v26, %s1491_s27  ;;  %602 = vrot.lane.b32.xlu0 %v1829_v5, %s1479_s23 }
 0x5a5   :  { %501 = vrot.lane.b32.xlu1 %v1829_v5, %s1486_s2  ;;  %606 = vrot.lane.b32.xlu0 %v1833_v28, %s1479_s23 }
 0x5a9   :  { %536 = vrot.lane.b32.xlu1 %v1829_v5, %s1487_s21  ;;  %659 = vrot.lane.b32.xlu0 %v1833_v28, %s1480_s24 }
 0x5ad   :  { %725 = vrot.lane.b32.xlu0 %v1833_v28, %s1490_s26  ;;  %505 = vrot.lane.b32.xlu1 %v1833_v28, %s1486_s2 }
 0x5b1   :  { %754 = vrot.lane.b32.xlu0 %v1829_v5, %s1491_s27  ;;  %573 = vrot.lane.b32.xlu1 %v1833_v28, %s1489_s25 }
 0x5b5   :  { %758 = vrot.lane.b32.xlu0 %v1833_v28, %s1491_s27  ;;  %655 = vrot.lane.b32.xlu1 %v1829_v5, %s1480_s24 }
 0x5b9   :  { %688 = vrot.lane.b32.xlu1 %v1829_v5, %s1488_s22 }
 0x5bd   :  { %721 = vrot.lane.b32.xlu1 %v1829_v5, %s1490_s26 }
 0x5c1   :  { %692 = vrot.lane.b32.xlu1 %v1833_v28, %s1488_s22 }
 0x5c5   :  { %756 = vrot.lane.b32.xlu1 %v1825_v27, %s1491_s27 }
 0x5c9   :  { %806 = vperm.xlu1 %1451, %v1553_v2  }
 0x5f3   :  { %v1896_v31 = vpop.permute.xlu1 %499  ;;  %v1898_v34 = vpop.permute.xlu0 %538 }
 0x5f7   :  { %v535_v35 = vpop.permute.xlu1 %534  ;;  %v1900_v36 = vpop.permute.xlu0 %604 }
 0x5fb   :  { %v1902_v37 = vpop.permute.xlu0 %657  ;;  %v1904_v38 = vpop.permute.xlu1 %503 }
 0x5ff   :  { %v1906_v39 = vpop.permute.xlu0 %690  ;;  %v1908_v40 = vpop.permute.xlu1 %567 }
 0x603   :  { %v1910_v43 = vpop.permute.xlu0 %723  ;;  %v1912_v44 = vpop.permute.xlu1 %600 }
 0x604   :  { %2565 = vst [vmem:[#allocation2_spill] sm:$0xff] %v1910_v43 }
 0x607   :  { %v1914_v2 = vpop.permute.xlu0 %719  ;;  %v1916_v45 = vpop.permute.xlu1 %571 }
 0x608   :  { %2566 = vst [vmem:[#allocation3_spill] sm:$0xff] %v1914_v2  ;;  %v2063_v2 = vrot.slane %v1940_v55, %v1599_v48 }
 0x60b   :  { %v1918_v46 = vpop.permute.xlu1 %653  ;;  %v541_v49 = vpop.permute.xlu0 %540 }
 0x60c   :  { %v546_v32 = vsel %vm542_vm5, %v541_v49, %v535_v35  ;;  %v543_v41 = vsel %vm542_vm5, %v1898_v34, %v541_v49 }
 0x60d   :  { %v563_v43 = vmul.f32 %v1959_v62, %v546_v32 }
 0x60f   :  { %v1920_v50 = vpop.permute.xlu1 %686  ;;  %v1922_v51 = vpop.permute.xlu0 %569 }
 0x610   :  { %v578_v20 = vsel %vm575_vm6, %v1908_v40, %v1922_v51 }
 0x611   :  { %v597_v54 = vmul.f32 %v1973_v3, %v578_v20  ;;  %v566_v20 = vmul.f32 %v1963_v63, %v543_v41 }
 0x613   :  { %v1942_v56 = vpop.permute.xlu1 %752  ;;  %v603_v57 = vpop.permute.xlu0 %602 }
 0x614   :  { %2568 = vst [vmem:[#allocation5_spill] sm:$0xff] %v1942_v56  ;;  %v611_v21 = vsel %vm608_vm7, %v1912_v44, %v603_v57 }
 0x617   :  { %v502_v7 = vpop.permute.xlu1 %501  ;;  %v607_v8 = vpop.permute.xlu0 %606 }
 0x618   :  { %v512_v16 = vsel %vm509_vm8, %v1896_v31, %v502_v7  ;;  %v609_v48 = vsel %vm608_vm7, %v1900_v36, %v607_v8  ;;  %v612_v49 = vsel %vm608_vm7, %v607_v8, %v1912_v44 }
 0x619   :  { %v531_v1 = vmul.f32 %v1991_v10, %v512_v16  ;;  %v630_v16 = vmul.f32 %v1982_v6, %v611_v21  ;;  %v629_v21 = vmul.f32 %v1999_v12, %v612_v49 }
 0x61b   :  { %v537_v17 = vpop.permute.xlu1 %536  ;;  %v660_v56 = vpop.permute.xlu0 %659 }
 0x61c   :  { %v545_v23 = vsel %vm542_vm5, %v535_v35, %v537_v17  ;;  %v544_v33 = vsel %vm542_vm5, %v537_v17, %v1898_v34  ;;  %v610_v17 = vsel %vm608_vm7, %v603_v57, %v1900_v36 }
 0x61d   :  { %v564_v35 = vmul.f32 %v2007_v14, %v545_v23  ;;  %v511_v23 = vsel %vm509_vm8, %v502_v7, %v1904_v38  ;;  %v565_v32 = vmul.f32 %v2011_v15, %v544_v33  ;;  %v631_v8 = vmul.f32 %v1987_v9, %v610_v17 }
 0x61e   :  { %v632_v33 = vmul.f32 %v2003_v13, %v609_v48  ;;  %v662_v17 = vsel %vm661_vm9, %v1902_v37, %v660_v56 }
 0x61f   :  { %v506_v10 = vpop.permute.xlu1 %505  ;;  %v786_v34 = vpack.c.bf16 %v564_v35, %v531_v1  ;;  %v577_v1 = vsel %vm575_vm6, %v1922_v51, %v1916_v45  ;;  %v726_v35 = vpop.permute.xlu0 %725 }
 0x620   :  { %v510_v57 = vsel %vm509_vm8, %v1904_v38, %v506_v10  ;;  %v513_v7 = vsel %vm509_vm8, %v506_v10, %v1896_v31  ;;  %v532_v38 = vmul.f32 %v1995_v11, %v511_v23  ;;  %v665_v31 = vsel %vm661_vm9, %v660_v56, %v1918_v46 }
 0x621   :  { %v530_v36 = vmul.f32 %v2027_v19, %v513_v7  ;;  %v533_v44 = vmul.f32 %v2040_v22, %v510_v57  ;;  %824 = vmatprep.subr.bf16.mxu0 %v786_v34  ;;  %v790_v10 = vpack.c.bf16 %v630_v16, %v597_v54  ;;  %v685_v16 = vmul.f32 %v2023_v42, %v665_v31 }
 0x622   :  { %v787_v63 = vpack.c.bf16 %v565_v32, %v532_v38  ;;  %v598_v34 = vmul.f32 %v1977_v4, %v577_v1  ;;  %v2119_v56 = vrot.slane %v1968_v0, %v1597_v47  ;;  %v652_v57 = vmul.f32 %v1951_v60, %v1833_v28 }
 0x623   :  { %v785_v51 = vpack.c.bf16 %v563_v43, %v530_v36  ;;  %v574_v41 = vpop.permute.xlu1 %573  ;;  %v788_v7 = vpack.c.bf16 %v566_v20, %v533_v44  ;;  %v650_v20 = vmul.f32 %v1955_v61, %v1829_v5  ;;  %v684_v1 = vmul.f32 %v2019_v18, %v662_v17 }
 0x624   :  { %v576_v23 = vsel %vm575_vm6, %v1916_v45, %v574_v41  ;;  %v579_v54 = vsel %vm575_vm6, %v574_v41, %v1908_v40  ;;  %v649_v45 = vmul.f32 %v1947_v30, %v1823_v26  ;;  %v791_v36 = vpack.c.bf16 %v631_v8, %v598_v34  ;;  %v2574_v34 = vld [vmem:[#allocation3_spill] sm:$0xff] }
 0x625   :  { %v596_v48 = vmul.f32 %v2046_v24, %v579_v54  ;;  %v599_v43 = vmul.f32 %v2050_v25, %v576_v23  ;;  %825 = vmatpush1.bf16.msra.mxu0 %v785_v51  ;;  %865 = vmatprep.subr.bf16.mxu1 %v788_v7  ;;  %v796_v5 = vpack.c.bf16 %v685_v16, %v652_v57  ;;  %v2575_v57 = vld [vmem:[#allocation5_spill] sm:$0xff] }
 0x626   :  { %826 = vmatprep.subr.bf16.mxu0 %v790_v10  ;;  %866 = vmatpush1.bf16.msra.mxu1 %v787_v63  ;;  %v2134_v63 = vpop.permute.xlu0 %754  ;;  %v651_v8 = vmul.f32 %v2119_v56, %v1825_v27  ;;  %v2144_v10 = vrot.slane %v1930_v53, %v1604_v58  ;;  %v2152_v27 = vrot.slane %v1930_v53, %v1606_v59  ;;  %v2571_v53 = vld [vmem:[#allocation4_spill] sm:$0xff] }
 0x627   :  { %v789_v40 = vpack.c.bf16 %v629_v21, %v596_v48  ;;  %v656_v49 = vpop.permute.xlu1 %655  ;;  %v792_v32 = vpack.c.bf16 %v632_v33, %v599_v43  ;;  %v2148_v21 = vrot.slane %v1940_v55, %v1604_v58  ;;  %v2156_v33 = vrot.slane %v1940_v55, %v1606_v59  ;;  %v2573_v48 = vld [vmem:[#allocation2_spill] sm:$0xff] }
 0x628   :  { %v663_v47 = vsel %vm661_vm9, %v656_v49, %v1902_v37  ;;  %v664_v26 = vsel %vm661_vm9, %v1918_v46, %v656_v49  ;;  %v795_v46 = vpack.c.bf16 %v684_v1, %v651_v8  ;;  %v2160_v51 = vrot.slane %v1968_v0, %v1606_v59 }
 0x629   :  { %v682_v44 = vmul.f32 %v2054_v29, %v664_v26  ;;  %v683_v28 = vmul.f32 %v2063_v2, %v663_v47  ;;  %827 = vmatpush1.bf16.msra.mxu0 %v789_v40  ;;  %867 = vmatprep.subr.bf16.mxu1 %v792_v32  ;;  %v2170_v17 = vrot.slane %v2571_v53, %v1606_v59 }
 0x62a   :  { %868 = vmatpush1.bf16.msra.mxu1 %v791_v36  ;;  %v759_v55 = vpop.permute.xlu0 %758  ;;  %v2175_v54 = vrot.slane %v1968_v0, %v1604_v58  ;;  %v2179_v16 = vrot.slane %v2571_v53, %v1604_v58  ;;  %v728_v43 = vsel %vm727_vm11, %v2573_v48, %v726_v35  ;;  %v731_v59 = vsel %vm727_vm11, %v726_v35, %v2574_v34  ;;  %v2200_v35 = vld [vmem:[%s2549_s7 + $0x20] ss:$0 sm:$0xff]  ;;  %v2209_v36 = vld [vmem:[%s2549_s7 + $0x38] ss:$0 sm:$0xff] }
 0x62b   :  { %v793_v38 = vpack.c.bf16 %v682_v44, %v649_v45  ;;  %v689_v37 = vpop.permute.xlu1 %688  ;;  %869 = vmatprep.subr.bf16.mxu1 %v796_v5  ;;  %v794_v31 = vpack.c.bf16 %v683_v28, %v650_v20  ;;  %v763_v20 = vsel %vm760_vm12, %v2575_v57, %v2134_v63  ;;  %2576 = vst [vmem:[#allocation2_spill] sm:$0xff] %v2209_v36 }
 0x62c   :  { %v696_v41 = vsel %vm694_vm10, %v689_v37, %v1906_v39  ;;  %v697_v7 = vsel %vm694_vm10, %v1920_v50, %v689_v37  ;;  %2572 = vst [vmem:[#allocation4_spill] sm:$0xff] %v2175_v54  ;;  %v764_v1 = vsel %vm760_vm12, %v759_v55, %v2575_v57  ;;  %v750_v28 = vmul.f32 %v2160_v51, %v728_v43 }
 0x62d   :  { %828 = vmatprep.subr.bf16.mxu0 %v794_v31  ;;  %v715_v40 = vmul.f32 %v2144_v10, %v697_v7  ;;  %v716_v58 = vmul.f32 %v2148_v21, %v696_v41  ;;  %v751_v5 = vmul.f32 %v2170_v17, %v731_v59  ;;  %v781_v37 = vmul.f32 %v2200_v35, %v763_v20  ;;  %v2229_v7 = vld [vmem:[%s2549_s7 + $0x28] ss:$0 sm:$0xff] }
 0x62e   :  { %829 = vmatpush1.bf16.msra.mxu0 %v793_v38  ;;  %870 = vmatpush1.bf16.msra.mxu1 %v795_v46  ;;  %v784_v31 = vmul.f32 %v2209_v36, %v764_v1  ;;  %v1493_v57 = vmov 6  }
 0x62f   :  { %v722_v23 = vpop.permute.xlu1 %721  ;;  %1452 = vset.pattern.permute.xlu0 %v1493_v57 }
 0x630   :  { %v729_v45 = vsel %vm727_vm11, %v722_v23, %v2573_v48  ;;  %v730_v0 = vsel %vm727_vm11, %v2574_v34, %v722_v23  ;;  %v801_v34 = vpack.c.bf16 %v781_v37, %v781_v37  ;;  %v804_v59 = vpack.c.bf16 %v784_v31, %v784_v31 }
 0x631   :  { %v748_v49 = vmul.f32 %v2152_v27, %v730_v0  ;;  %v749_v32 = vmul.f32 %v2156_v33, %v729_v45 }
 0x633   :  { %v797_v47 = vpack.c.bf16 %v748_v49, %v715_v40  ;;  %v693_v26 = vpop.permute.xlu1 %692  ;;  %v798_v44 = vpack.c.bf16 %v749_v32, %v716_v58  ;;  %v2578_v32 = vmov 0  }
 0x634   :  { %v695_v8 = vsel %vm694_vm10, %v1906_v39, %v693_v26  ;;  %v698_v38 = vsel %vm694_vm10, %v693_v26, %v1920_v50  ;;  %v2234_v39 = vld [vmem:[%s2549_s7 + $0x30] ss:$0 sm:$0xff] }
 0x635   :  { %v717_v46 = vmul.f32 %v2175_v54, %v695_v8  ;;  %v718_v41 = vmul.f32 %v2179_v16, %v698_v38  ;;  %830 = vmatprep.subr.bf16.mxu0 %v798_v44  ;;  %2577 = vst [vmem:[#allocation3_spill] sm:$0xff] %v2234_v39 }
 0x636   :  { %831 = vmatpush1.bf16.msra.mxu0 %v797_v47 }
 0x637   :  { %v799_v50 = vpack.c.bf16 %v750_v28, %v717_v46  ;;  %v757_v53 = vpop.permute.xlu1 %756  ;;  %v800_v23 = vpack.c.bf16 %v751_v5, %v718_v41 }
 0x638   :  { %v761_v48 = vsel %vm760_vm12, %v757_v53, %v759_v55  ;;  %v762_v43 = vsel %vm760_vm12, %v2134_v63, %v757_v53  ;;  %v813_v55 = vsel %vm223_vm2, %v801_v34, 0  ;;  %v498_v63 = vld [vmem:[%s2550_s4] sm:$0x3] }
 0x639   :  { %v782_v45 = vmul.f32 %v2229_v7, %v762_v43  ;;  %v783_v0 = vmul.f32 %v2234_v39, %v761_v48  ;;  %871 = vmatprep.subr.bf16.mxu1 %v800_v23 }
 0x63a   :  { %872 = vmatpush1.bf16.msra.mxu1 %v799_v50 }
 0x63b   :  { %v802_v40 = vpack.c.bf16 %v782_v45, %v782_v45  ;;  %v803_v58 = vpack.c.bf16 %v783_v0, %v783_v0  ;;  %1308 = vmatprep.subr.msk.bf16.mxu1 %vm223_vm2, %v804_v59  ;;  %v2260_v45 = vld [vmem:[%s2544_s8] sm:$0xff]  ;;  %v1494_v0 = vmov 7  }
 0x63c   :  { %1453 = vset.pattern.permute.xlu1 %v1494_v0 }
 0x63d   :  { %1306 = vmatprep.subr.msk.bf16.mxu0 %vm223_vm2, %v802_v40  ;;  %v819_v49 = vsel %vm223_vm2, %v803_v58, 0 }
 0x63e   :  { %833 = vmatpush1.bf16.msra.mxu0 %v813_v55  ;;  %874 = vmatpush1.bf16.msra.mxu1 %v819_v49 }
 0x641   :  { %1307 = vmatmul.mubr.msk.bf16.vlgmr.msra.gmra.mrb[4].mxu0 %vm219_vm3, %v498_v63  ;;  %1309 = vmatmul.mubr.msk.bf16.vlgmr.msra.gmra.mrb[8].mxu1 %vm219_vm3, %v498_v63  ;;  %vm1182_vm3 = vcmask 293888  }
 0x642   :  { %1231 = vmatprep.mubr.bf16.mxu0 %v2578_v32 }
 0x648   :  { %v807_v20 = vpop.permute.xlu1 %806 }
 0x714   :  { %v858_v1 = vpop.f32.mrb[4].mxu0  ;;  %v899_v47 = vpop.f32.mrb[8].mxu1 }
 0x715   :  { %v859_v26 = vadd.f32 %v858_v1, %v807_v20  ;;  %v860_v44 = vpop.f32.mrb[5].mxu0  ;;  %v901_v28 = vpop.f32.mrb[9].mxu1  ;;  %v900_v5 = vadd.f32 %v899_v47, %v807_v20 }
 0x716   :  { %v861_v8 = vadd.f32 %v860_v44, %v807_v20  ;;  %v862_v38 = vpop.f32.mrb[6].mxu0  ;;  %v903_v37 = vpop.f32.mrb[10].mxu1  ;;  %v902_v53 = vadd.f32 %v901_v28, %v807_v20 }
 0x717   :  { %v906_v31 = vsel %vm223_vm2, %v859_v26, 0.0  ;;  %v863_v46 = vpop.f32.mrb[7].mxu0  ;;  %v904_v41 = vpop.f32.mrb[11].mxu1  ;;  %v909_v48 = vsel %vm223_vm2, %v900_v5, 0.0 }
 0x718   :  { %v907_v50 = vsel %vm223_vm2, %v861_v8, 0.0  ;;  %v911_v34 = vsel %vm223_vm2, %v902_v53, 0.0 }
 0x719   :  { %v908_v23 = vadd.f32 %v907_v50, %v906_v31 }
 0x71b   :  { %v910_v43 = vadd.f32 %v909_v48, %v908_v23 }
 0x71d   :  { %v912_v59 = vadd.f32 %v911_v34, %v910_v43 }
 0x71f   :  { %913 = vadd.xlane.f32.xlu0 %v912_v59 }
 0x735   :  { %936 = vperm.xlu0 %1452, %v2260_v45  }
 0x7ac   :  { %v914_v40 = vpop.xlane.xlu0 %913 }
 0x7ad   :  { %v916_v58 = vmul.f32 0.001953125, %v914_v40 }
 0x7af   :  { %v917_v55 = vsub.f32 %v859_v26, %v916_v58  ;;  %v918_v49 = vsub.f32 %v861_v8, %v916_v58  ;;  %v919_v63 = vsub.f32 %v900_v5, %v916_v58  ;;  %v920_v57 = vsub.f32 %v902_v53, %v916_v58 }
 0x7b1   :  { %v921_v20 = vmul.f32 %v917_v55, %v917_v55  ;;  %v922_v1 = vmul.f32 %v918_v49, %v918_v49  ;;  %v923_v47 = vmul.f32 %v919_v63, %v919_v63  ;;  %v924_v44 = vmul.f32 %v920_v57, %v920_v57 }
 0x7b3   :  { %v925_v28 = vsel %vm223_vm2, %v921_v20, 0.0  ;;  %v926_v38 = vsel %vm223_vm2, %v922_v1, 0.0  ;;  %v928_v31 = vsel %vm223_vm2, %v923_v47, 0.0  ;;  %v930_v41 = vsel %vm223_vm2, %v924_v44, 0.0 }
 0x7b4   :  { %v927_v37 = vadd.f32 %v926_v38, %v925_v28  ;;  %v937_v53 = vpop.permute.xlu0 %936 }
 0x7b5   :  { %v939_v23 = vmul.f32 %v937_v53, %v917_v55  ;;  %v940_v48 = vmul.f32 %v937_v53, %v918_v49  ;;  %v942_v40 = vmul.f32 %v937_v53, %v920_v57 }
 0x7b6   :  { %v929_v46 = vadd.f32 %v928_v31, %v927_v37  ;;  %v941_v37 = vmul.f32 %v937_v53, %v919_v63 }
 0x7b8   :  { %v931_v50 = vadd.f32 %v930_v41, %v929_v46 }
 0x7ba   :  { %932 = vadd.xlane.f32.xlu1 %v931_v50  ;;  %v1495_v50 = vmov 8  }
 0x7bb   :  { %1454 = vset.pattern.permute.xlu0 %v1495_v50 }
 0x7cb   :  { %950 = vperm.xlu1 %1453, %v2260_v45  }
 0x847   :  { %v933_v26 = vpop.xlane.xlu1 %932 }
 0x848   :  { %v934_v5 = vmul.f32 0.001953125, %v933_v26 }
 0x84a   :  { %v943_v8 = vadd.f32 0.8, %v934_v5 }
 0x84b   :  { %v951_v34 = vpop.permute.xlu1 %950 }
 0x84c   :  { %1459 = vrsqrt.f32 %v943_v8 }
 0x856   :  { %v1460_v43 = vpop.eup %1459 }
 0x857   :  { %v945_v59 = vmul.f32 %v1460_v43, %v939_v23  ;;  %v946_v0 = vmul.f32 %v1460_v43, %v940_v48  ;;  %v948_v20 = vmul.f32 %v1460_v43, %v942_v40  ;;  %v947_v31 = vmul.f32 %v1460_v43, %v941_v37 }
 0x859   :  { %v953_v58 = vadd.f32 %v951_v34, %v945_v59  ;;  %v954_v1 = vadd.f32 %v951_v34, %v946_v0  ;;  %v956_v44 = vadd.f32 %v951_v34, %v948_v20  ;;  %v955_v46 = vadd.f32 %v951_v34, %v947_v31 }
 0x85b   :  { %vm957_vm13 = vcmp.gt.f32.partialorder %v953_v58, 0.0  ;;  %v961_v47 = vmul.f32 0.2, %v953_v58  ;;  %v962_v28 = vmul.f32 0.2, %v954_v1  ;;  %vm958_vm14 = vcmp.gt.f32.partialorder %v954_v1, 0.0 }
 0x85c   :  { %v964_v55 = vmul.f32 0.2, %v956_v44  ;;  %vm960_vm15 = vcmp.gt.f32.partialorder %v956_v44, 0.0  ;;  %v963_v41 = vmul.f32 0.2, %v955_v46  ;;  %vm959_vm0 = vcmp.gt.f32.partialorder %v955_v46, 0.0 }
 0x85d   :  { %v2268_v38 = vsel %vm957_vm13, %v953_v58, %v961_v47  ;;  %v2274_v49 = vsel %vm958_vm14, %v954_v1, %v962_v28 }
 0x85e   :  { %970 = vrot.lane.b32.xlu0 %v2268_v38, %s1486_s2  ;;  %986 = vrot.lane.b32.xlu1 %v2268_v38, %s1487_s21  ;;  %v2280_v57 = vsel %vm960_vm15, %v956_v44, %v964_v55  ;;  %v2310_v63 = vsel %vm959_vm0, %v955_v46, %v963_v41  ;;  %v2579_v41 = vld [vmem:[#allocation7_spill] sm:$0xff] }
 0x862   :  { %1002 = vrot.lane.b32.xlu0 %v2268_v38, %s1489_s25  ;;  %988 = vrot.lane.b32.xlu1 %v2274_v49, %s1487_s21 }
 0x866   :  { %976 = vrot.lane.b32.xlu0 %v2280_v57, %s1486_s2  ;;  %1018 = vrot.lane.b32.xlu1 %v2268_v38, %s1479_s23 }
 0x86a   :  { %1040 = vrot.lane.b32.xlu0 %v2274_v49, %s1480_s24  ;;  %1020 = vrot.lane.b32.xlu1 %v2274_v49, %s1479_s23 }
 0x86e   :  { %1072 = vrot.lane.b32.xlu0 %v2274_v49, %s1490_s26  ;;  %992 = vrot.lane.b32.xlu1 %v2280_v57, %s1487_s21 }
 0x872   :  { %1038 = vrot.lane.b32.xlu0 %v2268_v38, %s1480_s24  ;;  %1024 = vrot.lane.b32.xlu1 %v2280_v57, %s1479_s23 }
 0x876   :  { %1056 = vrot.lane.b32.xlu0 %v2274_v49, %s1488_s22  ;;  %972 = vrot.lane.b32.xlu1 %v2274_v49, %s1486_s2 }
 0x87a   :  { %1054 = vrot.lane.b32.xlu0 %v2268_v38, %s1488_s22  ;;  %1004 = vrot.lane.b32.xlu1 %v2274_v49, %s1489_s25 }
 0x87e   :  { %1088 = vrot.lane.b32.xlu0 %v2274_v49, %s1491_s27  ;;  %1008 = vrot.lane.b32.xlu1 %v2280_v57, %s1489_s25 }
 0x882   :  { %990 = vrot.lane.b32.xlu0 %v2310_v63, %s1487_s21  ;;  %1042 = vrot.lane.b32.xlu1 %v2310_v63, %s1480_s24 }
 0x886   :  { %974 = vrot.lane.b32.xlu0 %v2310_v63, %s1486_s2  ;;  %1074 = vrot.lane.b32.xlu1 %v2310_v63, %s1490_s26 }
 0x88a   :  { %1044 = vrot.lane.b32.xlu0 %v2280_v57, %s1480_s24  ;;  %1070 = vrot.lane.b32.xlu1 %v2268_v38, %s1490_s26 }
 0x88e   :  { %1060 = vrot.lane.b32.xlu0 %v2280_v57, %s1488_s22  ;;  %1058 = vrot.lane.b32.xlu1 %v2310_v63, %s1488_s22 }
 0x892   :  { %1086 = vrot.lane.b32.xlu1 %v2268_v38, %s1491_s27  ;;  %1179 = vperm.xlu0 %1454, %v2260_v45  }
 0x896   :  { %1090 = vrot.lane.b32.xlu1 %v2310_v63, %s1491_s27 }
 0x89a   :  { %1022 = vrot.lane.b32.xlu1 %v2310_v63, %s1479_s23 }
 0x89e   :  { %1006 = vrot.lane.b32.xlu1 %v2310_v63, %s1489_s25 }
 0x8a2   :  { %1076 = vrot.lane.b32.xlu1 %v2280_v57, %s1490_s26 }
 0x8a6   :  { %1092 = vrot.lane.b32.xlu1 %v2280_v57, %s1491_s27 }
 0x8d0   :  { %v971_v26 = vpop.permute.xlu0 %970  ;;  %v987_v5 = vpop.permute.xlu1 %986 }
 0x8d4   :  { %v1003_v8 = vpop.permute.xlu0 %1002  ;;  %v2341_v53 = vpop.permute.xlu1 %988 }
 0x8d5   :  { %v996_v45 = vsel %vm542_vm5, %v987_v5, %v2341_v53 }
 0x8d6   :  { %v999_v28 = vmul.f32 %v996_v45, %v2007_v14 }
 0x8d8   :  { %v2343_v23 = vpop.permute.xlu0 %976  ;;  %v1019_v48 = vpop.permute.xlu1 %1018  ;;  %v1107_v39 = vrot.slane %v999_v28, 4 }
 0x8dc   :  { %v1041_v43 = vpop.permute.xlu0 %1040  ;;  %v2345_v34 = vpop.permute.xlu1 %1020 }
 0x8dd   :  { %v1028_v20 = vsel %vm608_vm7, %v1019_v48, %v2345_v34 }
 0x8de   :  { %v1031_v55 = vmul.f32 %v1028_v20, %v1982_v6 }
 0x8e0   :  { %v1073_v59 = vpop.permute.xlu0 %1072  ;;  %v2347_v0 = vpop.permute.xlu1 %992  ;;  %v1119_v54 = vrot.slane %v1031_v55, 4 }
 0x8e1   :  { %v997_v47 = vsel %vm542_vm5, %v2347_v0, %v987_v5 }
 0x8e2   :  { %v998_v46 = vmul.f32 %v997_v47, %v1959_v62 }
 0x8e4   :  { %v2349_v40 = vpop.permute.xlu1 %1024  ;;  %v2351_v58 = vpop.permute.xlu0 %1038  ;;  %v1106_v45 = vrot.slane %v998_v46, 4 }
 0x8e5   :  { %v1029_v37 = vsel %vm608_vm7, %v2349_v40, %v1019_v48  ;;  %v981_v48 = vsel %vm509_vm8, %v2343_v23, %v971_v26 }
 0x8e6   :  { %v1030_v14 = vmul.f32 %v1029_v37, %v1999_v12 }
 0x8e8   :  { %v2359_v1 = vpop.permute.xlu1 %972  ;;  %v1057_v31 = vpop.permute.xlu0 %1056  ;;  %v1118_v55 = vrot.slane %v1030_v14, 4 }
 0x8e9   :  { %v980_v44 = vsel %vm509_vm8, %v971_v26, %v2359_v1 }
 0x8ea   :  { %v983_v50 = vmul.f32 %v980_v44, %v2579_v41 }
 0x8ec   :  { %v2374_v36 = vpop.permute.xlu1 %1004  ;;  %v1151_v20 = vsel %vm223_vm2, %v983_v50, %v1107_v39  ;;  %v2388_v44 = vpop.permute.xlu0 %1054 }
 0x8ed   :  { %v1012_v5 = vsel %vm575_vm6, %v1003_v8, %v2374_v36 }
 0x8ee   :  { %v1015_v6 = vmul.f32 %v1012_v5, %v1973_v3  ;;  %v982_v3 = vmul.f32 %v981_v48, %v2027_v19  ;;  %v1048_v19 = vsel %vm661_vm9, %v2351_v58, %v1041_v43 }
 0x8f0   :  { %v2384_v62 = vpop.permute.xlu1 %1008  ;;  %v1155_v47 = vsel %vm223_vm2, %v1015_v6, %v1119_v54  ;;  %v1150_v26 = vsel %vm223_vm2, %v982_v3, %v1106_v45  ;;  %v1089_v54 = vpop.permute.xlu0 %1088  ;;  %v1050_v6 = vmul.f32 %v1048_v19, %v2054_v29 }
 0x8f1   :  { %v1013_v28 = vsel %vm575_vm6, %v2384_v62, %v1003_v8  ;;  %v1167_v12 = vpack.c.bf16 %v1155_v47, %v1151_v20  ;;  %v1064_v20 = vsel %vm694_vm10, %v2388_v44, %v1057_v31 }
 0x8f2   :  { %v1014_v37 = vmul.f32 %v1013_v28, %v2046_v24  ;;  %v1130_v3 = vrot.slane %v1050_v6, 4  ;;  %v1066_v29 = vmul.f32 %v1064_v20, %v2144_v10 }
 0x8f3   :  { %1199 = vmatprep.subr.bf16.mxu0 %v1167_v12 }
 0x8f4   :  { %v1154_v46 = vsel %vm223_vm2, %v1014_v37, %v1118_v55  ;;  %v1043_v39 = vpop.permute.xlu1 %1042  ;;  %v991_v48 = vpop.permute.xlu0 %990 }
 0x8f5   :  { %v1166_v41 = vpack.c.bf16 %v1154_v46, %v1150_v26  ;;  %v1047_v8 = vsel %vm661_vm9, %v1041_v43, %v1043_v39  ;;  %v1035_v26 = vmul.f32 %v2274_v49, %v1955_v61  ;;  %v995_v6 = vsel %vm542_vm5, %v2341_v53, %v991_v48 }
 0x8f6   :  { %v1051_v5 = vmul.f32 %v1047_v8, %v2063_v2 }
 0x8f7   :  { %1200 = vmatpush1.bf16.msra.mxu0 %v1166_v41 }
 0x8f8   :  { %v2397_v50 = vpop.permute.xlu1 %1074  ;;  %v1131_v28 = vrot.slane %v1051_v5, 4  ;;  %v994_v5 = vsel %vm542_vm5, %v991_v48, %v2347_v0 }
 0x8f9   :  { %v1079_v24 = vsel %vm727_vm11, %v1073_v59, %v2397_v50 }
 0x8fa   :  { %v1083_v43 = vmul.f32 %v1079_v24, %v2156_v33  ;;  %v975_v33 = vpop.permute.xlu0 %974  ;;  %v1159_v10 = vsel %vm223_vm2, %v1035_v26, %v1131_v28 }
 0x8fb   :  { %v978_v20 = vsel %vm509_vm8, %v975_v33, %v2343_v23 }
 0x8fc   :  { %v2408_v14 = vpop.permute.xlu1 %1070 }
 0x8fd   :  { %v1080_v45 = vsel %vm727_vm11, %v2408_v14, %v1073_v59  ;;  %v1143_v59 = vrot.slane %v1083_v43, 4 }
 0x8fe   :  { %v1082_v47 = vmul.f32 %v1080_v45, %v2152_v27  ;;  %v1034_v27 = vmul.f32 %v2268_v38, %v1947_v30  ;;  %v1045_v38 = vpop.permute.xlu0 %1044 }
 0x8ff   :  { %v1046_v43 = vsel %vm661_vm9, %v1043_v39, %v1045_v38  ;;  %v1049_v0 = vsel %vm661_vm9, %v1045_v38, %v2351_v58 }
 0x900   :  { %v1142_v12 = vrot.slane %v1082_v47, 4  ;;  %v2419_v2 = vpop.permute.xlu1 %1058  ;;  %v2580_v47 = vld [vmem:[#allocation6_spill] sm:$0xff] }
 0x901   :  { %v1063_v55 = vsel %vm694_vm10, %v1057_v31, %v2419_v2  ;;  %v1158_v31 = vsel %vm223_vm2, %v1034_v27, %v1130_v3  ;;  %v1001_v28 = vmul.f32 %v994_v5, %v2580_v47  ;;  %v985_v3 = vmul.f32 %v978_v20, %v2040_v22 }
 0x902   :  { %v1067_v37 = vmul.f32 %v1063_v55, %v2148_v21  ;;  %v1162_v46 = vsel %vm223_vm2, %v1066_v29, %v1142_v12  ;;  %v1052_v29 = vmul.f32 %v1046_v43, %v2019_v18 }
 0x903   :  { %v1170_v49 = vpack.c.bf16 %v1162_v46, %v1158_v31  ;;  %v1109_v55 = vrot.slane %v1001_v28, 4 }
 0x904   :  { %v2431_v41 = vpop.permute.xlu1 %1086  ;;  %v1163_v8 = vsel %vm223_vm2, %v1067_v37, %v1143_v59  ;;  %v1061_v59 = vpop.permute.xlu0 %1060 }
 0x905   :  { %v1096_v21 = vsel %vm760_vm12, %v2431_v41, %v1089_v54  ;;  %v1171_v19 = vpack.c.bf16 %v1163_v8, %v1159_v10  ;;  %v1153_v10 = vsel %vm223_vm2, %v985_v3, %v1109_v55 }
 0x906   :  { %v1098_v61 = vmul.f32 %v2200_v35, %v1096_v21 }
 0x907   :  { %1201 = vmatprep.subr.bf16.mxu0 %v1171_v19 }
 0x908   :  { %v2440_v30 = vpop.permute.xlu1 %1090  ;;  %1202 = vmatpush1.bf16.msra.mxu0 %v1170_v49  ;;  %v1174_v45 = vpack.c.bf16 %v1098_v61, %v1098_v61  ;;  %v1037_v49 = vmul.f32 %v2280_v57, %v1951_v60 }
 0x909   :  { %v1095_v24 = vsel %vm760_vm12, %v1089_v54, %v2440_v30  ;;  %v979_v54 = vsel %vm509_vm8, %v2359_v1, %v975_v33  ;;  %v1132_v33 = vrot.slane %v1052_v29, 4 }
 0x90a   :  { %v1099_v35 = vmul.f32 %v2229_v7, %v1095_v24  ;;  %v1000_v7 = vmul.f32 %v995_v6, %v2011_v15  ;;  %v1188_v58 = vsel %vm1186_vm1, %v1174_v45, 0  ;;  %v984_v15 = vmul.f32 %v979_v54, %v1995_v11 }
 0x90c   :  { %v1175_v53 = vpack.c.bf16 %v1099_v35, %v1099_v35  ;;  %v1023_v48 = vpop.permute.xlu1 %1022 }
 0x90d   :  { %v1026_v23 = vsel %vm608_vm7, %v1023_v48, %v2349_v40  ;;  %v1027_v1 = vsel %vm608_vm7, %v2345_v34, %v1023_v48  ;;  %v1053_v40 = vmul.f32 %v1049_v0, %v2023_v42 }
 0x90e   :  { %v1032_v39 = vmul.f32 %v1027_v1, %v1987_v9  ;;  %v1033_v12 = vmul.f32 %v1026_v23, %v2003_v13  ;;  %1310 = vmatprep.subr.msk.bf16.mxu0 %vm1186_vm1, %v1175_v53  ;;  %v969_v9 = vld [vmem:[%s2551_s5] sm:$0x3]  ;;  %v1108_v13 = vrot.slane %v1000_v7, 4 }
 0x90f   :  { %1204 = vmatpush1.bf16.msra.mxu0 %v1188_v58  ;;  %v1133_v46 = vrot.slane %v1053_v40, 4 }
 0x910   :  { %v1007_v34 = vpop.permute.xlu1 %1006  ;;  %v1120_v18 = vrot.slane %v1032_v39, 4  ;;  %v1121_v22 = vrot.slane %v1033_v12, 4  ;;  %v1152_v27 = vsel %vm223_vm2, %v984_v15, %v1108_v13 }
 0x911   :  { %v1010_v37 = vsel %vm575_vm6, %v1007_v34, %v2384_v62  ;;  %v1011_v11 = vsel %vm575_vm6, %v2374_v36, %v1007_v34  ;;  %v1065_v36 = vsel %vm694_vm10, %v1061_v59, %v2388_v44  ;;  %v1161_v60 = vsel %vm223_vm2, %v1037_v49, %v1133_v46 }
 0x912   :  { %v1016_v42 = vmul.f32 %v1011_v11, %v1977_v4  ;;  %v1017_v26 = vmul.f32 %v1010_v37, %v2050_v25  ;;  %1311 = vmatmul.mubr.msk.bf16.vlgmr.msra.gmra.mrb[8].mxu0 %vm1182_vm3, %v969_v9  ;;  %v1062_v4 = vsel %vm694_vm10, %v2419_v2, %v1061_v59  ;;  %v1036_v2 = vmul.f32 %v2310_v63, %v2119_v56  ;;  %v2583_v63 = vld [vmem:[#allocation2_spill] sm:$0xff] }
 0x913   :  { %1272 = vmatprep.mubr.bf16.mxu0 %v2578_v32  ;;  %v1069_v38 = vmul.f32 %v1065_v36, %v2179_v16  ;;  %v2582_v16 = vld [vmem:[#allocation3_spill] sm:$0xff] }
 0x914   :  { %v1156_v25 = vsel %vm223_vm2, %v1016_v42, %v1120_v18  ;;  %v1077_v62 = vpop.permute.xlu1 %1076  ;;  %v1157_v8 = vsel %vm223_vm2, %v1017_v26, %v1121_v22  ;;  %v1160_v45 = vsel %vm223_vm2, %v1036_v2, %v1132_v33 }
 0x915   :  { %v1078_v31 = vsel %vm727_vm11, %v2397_v50, %v1077_v62  ;;  %v1081_v32 = vsel %vm727_vm11, %v1077_v62, %v2408_v14  ;;  %v1169_v21 = vpack.c.bf16 %v1157_v8, %v1153_v10  ;;  %v1168_v19 = vpack.c.bf16 %v1156_v25, %v1152_v27  ;;  %v2581_v50 = vld [vmem:[#allocation4_spill] sm:$0xff] }
 0x916   :  { %v1084_v44 = vmul.f32 %v1078_v31, %v2160_v51  ;;  %v1085_v61 = vmul.f32 %v1081_v32, %v2170_v17  ;;  %v1068_v24 = vmul.f32 %v1062_v4, %v2581_v50 }
 0x917   :  { %1240 = vmatprep.subr.bf16.mxu0 %v1169_v21 }
 0x918   :  { %v1144_v5 = vrot.slane %v1084_v44, 4  ;;  %v1145_v6 = vrot.slane %v1085_v61, 4  ;;  %v1093_v14 = vpop.permute.xlu1 %1092  ;;  %1241 = vmatpush1.bf16.msra.mxu0 %v1168_v19 }
 0x919   :  { %v1094_v51 = vsel %vm760_vm12, %v2440_v30, %v1093_v14  ;;  %v1097_v56 = vsel %vm760_vm12, %v1093_v14, %v2431_v41  ;;  %v1180_v41 = vpop.permute.xlu0 %1179 }
 0x91a   :  { %v1164_v17 = vsel %vm223_vm2, %v1068_v24, %v1144_v5  ;;  %v1100_v57 = vmul.f32 %v2582_v16, %v1094_v51  ;;  %v1101_v35 = vmul.f32 %v2583_v63, %v1097_v56  ;;  %v1165_v20 = vsel %vm223_vm2, %v1069_v38, %v1145_v6 }
 0x91b   :  { %v1173_v54 = vpack.c.bf16 %v1165_v20, %v1161_v60  ;;  %v1172_v43 = vpack.c.bf16 %v1164_v17, %v1160_v45 }
 0x91c   :  { %v1177_v0 = vpack.c.bf16 %v1101_v35, %v1101_v35  ;;  %v1176_v53 = vpack.c.bf16 %v1100_v57, %v1100_v57 }
 0x91d   :  { %1242 = vmatprep.subr.bf16.mxu0 %v1173_v54 }
 0x91e   :  { %1243 = vmatpush1.bf16.msra.mxu0 %v1172_v43  ;;  %v1194_v52 = vsel %vm1186_vm1, %v1176_v53, 0 }
 0x91f   :  { %1312 = vmatprep.subr.msk.bf16.mxu0 %vm1186_vm1, %v1177_v0 }
 0x922   :  { %1245 = vmatpush1.bf16.msra.mxu0 %v1194_v52 }
 0x925   :  { %1313 = vmatmul.mubr.msk.bf16.vlgmr.msra.gmra.mrb[12].mxu0 %vm1182_vm3, %v969_v9 }
 0x9e5   :  { %v1233_v30 = vpop.f32.mrb[8].mxu0 }
 0x9e6   :  { %v1235_v48 = vpop.f32.mrb[9].mxu0  ;;  %v1234_v7 = vadd.f32 %v1233_v30, %v1180_v41 }
 0x9e7   :  { %v1237_v47 = vpop.f32.mrb[10].mxu0  ;;  %v1236_v28 = vadd.f32 %v1235_v48, %v1180_v41 }
 0x9e8   :  { %1461 = vtanh.f32 %v1234_v7  ;;  %v1238_v23 = vpop.f32.mrb[11].mxu0 }
 0x9e9   :  { %1463 = vtanh.f32 %v1236_v28 }
 0x9f2   :  { %v1462_v1 = vpop.eup %1461 }
 0x9f3   :  { %v1464_v39 = vpop.eup %1463  ;;  %1285 = vst [vmem:[%s2552_s9] sm:$0x7] %v1462_v1 }
 0x9f4   :  { %1286 = vst [vmem:[%s2552_s9 + $0x8] sm:$0x7] %v1464_v39 }
 0x9f8   :  { %v1274_v12 = vpop.f32.mrb[12].mxu0 }
 0x9f9   :  { %v1275_v58 = vadd.f32 %v1274_v12, %v1180_v41  ;;  %v1276_v15 = vpop.f32.mrb[13].mxu0 }
 0x9fa   :  { %v1277_v3 = vadd.f32 %v1276_v15, %v1180_v41  ;;  %v1278_v29 = vpop.f32.mrb[14].mxu0 }
 0x9fb   :  { %1465 = vtanh.f32 %v1275_v58  ;;  %v1279_v40 = vpop.f32.mrb[15].mxu0 }
 0x9fc   :  { %1467 = vtanh.f32 %v1277_v3 }
 0xa05   :  { %v1466_v9 = vpop.eup %1465 }
 0xa06   :  { %v1468_v34 = vpop.eup %1467  ;;  %v1289_v13 = vrot.slane %v1466_v9, 5 }
 0xa07   :  { %v1290_v55 = vrot.slane %v1468_v34, 5 }
 0xa08   :  { %1293 = vst [vmem:[%s2552_s9] sm:$0x38] %v1289_v13 }
 0xa09   :  { %1294 = vst [vmem:[%s2552_s9 + $0x8] sm:$0x38] %v1290_v55 }

</bundles_post_ra>
